<compile_context>
chip_gen: v7x
topology: tpu7x:2x2x1
jax: 0.10.0
libtpu: 0.0.40
codegen_flags: <defaults>
</compile_context>

<pallas_src>
from functools import partial

import jax
import jax.numpy as jnp
from jax.experimental import pallas as pl
from jax.experimental.pallas import tpu as pltpu


def _mhgat_kernel(adj_t_ref, x_ref, xt_ref, wfused_ref, asrc_t_ref, o_ref):
    n = x_ref.shape[0]
    num_heads = asrc_t_ref.shape[0]
    f_out = o_ref.shape[1]

    adj = adj_t_ref[...].astype(jnp.float32)      # 0/1 mask; bf16 input, exact, cast once
    x_bf = x_ref[...]                             # [N, F_in]  bf16

    # One lane-dense MXU pass for ALL heads:
    #   columns [0, H*F_out)            -> per-head transformed features h_all
    #   columns [H*F_out, H*F_out + H)  -> per-head destination scores er
    he = jnp.dot(x_bf, wfused_ref[...], preferred_element_type=jnp.float32)      # [N, >=H*F_out+H]
    # Source scores as ROWS (no in-kernel transpose): el_rows[h, :] = (X @ al_h)^T
    el_rows = jnp.dot(asrc_t_ref[...], xt_ref[...], preferred_element_type=jnp.float32)  # [H, N]

    inv_heads = jnp.float32(1.0 / num_heads)
    acc = jnp.zeros((n, f_out), jnp.float32)
    for h in range(num_heads):                                       # static, unrolled (H = 2)
        er_col = he[:, num_heads * f_out + h:num_heads * f_out + h + 1]   # [N, 1]
        el_row = el_rows[h:h + 1, :]                                  # [1, N]
        e = er_col + el_row                                           # e[dst, src] = er[dst] + el[src]
        e = jnp.where(e > 0, e, 0.01 * e)                             # leaky_relu (slope 0.01)
        m = jnp.max(e, axis=-1, keepdims=True)                        # unmasked max: valid exp shift
        p = jnp.exp(e - m) * adj                                      # masked, unnormalized attention
        rowsum = jnp.maximum(jnp.sum(p, axis=-1, keepdims=True), jnp.float32(1e-30))
        inv = pl.reciprocal(rowsum, approx=True) * inv_heads          # EUP; head-mean folded in
        h_head = he[:, h * f_out:(h + 1) * f_out].astype(jnp.bfloat16)    # [N, F_out]  bf16 MXU operand
        acc = acc + jnp.dot(p.astype(jnp.bfloat16), h_head,
                            preferred_element_type=jnp.float32) * inv     # normalize after the matmul

    merged = acc                                                      # already mean over heads
    # activation := ELU (the module takes `activation` as a parameter)
    o_ref[...] = jnp.where(merged > 0, merged, jnp.exp(merged) - 1.0).astype(o_ref.dtype)


def pack_gat_params(w_heads, al_heads, ar_heads):
    """One-time (init-time) parameter packing — hoisted out of the per-call hot path.

    Returns:
      w_fused:    [F_in, pad128(H*F_out + H)]  bf16  — per-head W blocks, then per-head ar
                  columns, zero-padded to a lane-dense multiple of 128.
      attn_src_t: [H, F_in]                    bf16  — per-head al vectors as rows.
    """
    num_heads, f_in, f_out = w_heads.shape
    w_cat = jnp.transpose(w_heads, (1, 0, 2)).reshape(f_in, num_heads * f_out)  # [F_in, H*F_out]
    attn_dst = jnp.transpose(ar_heads)                                          # [F_in, H]
    fused = jnp.concatenate([w_cat, attn_dst], axis=1)                          # [F_in, H*F_out+H]
    pad = (-fused.shape[1]) % 128
    if pad:
        fused = jnp.pad(fused, ((0, 0), (0, pad)))
    return fused.astype(jnp.bfloat16), al_heads.astype(jnp.bfloat16)


@partial(jax.jit, static_argnames=("f_out",))
def multi_head_gat_forward(adj_t_bf16, x, w_fused, attn_src_t, *, f_out):
    """Fused MultiHeadGATLayer forward (jitted; packed params precomputed at init).

    adj_t_bf16: [N, N]   dense 0/1 mask (bf16), adj_t[dst, src] = 1 iff edge src->dst
    x:          [N, F_in] f32 node features
    w_fused / attn_src_t: outputs of pack_gat_params
    returns:    [N, F_out] f32 = ELU(mean over heads of GAT head outputs)
    """
    n, _ = x.shape
    x_bf = x.astype(jnp.bfloat16)     # MXU operands in bf16 (f32 accumulate in-kernel)
    xt_bf = x_bf.T                    # packed in the wrapper: no in-kernel transpose

    vmem = pl.BlockSpec(memory_space=pltpu.MemorySpace.VMEM)
    # TODO(synk): for N >~ 2K, switch to a dst-row grid (online softmax over src tiles,
    # dimension_semantics=("parallel",), tiles sized against v7x's 64 MiB VMEM).
    return pl.pallas_call(
        _mhgat_kernel,
        out_shape=jax.ShapeDtypeStruct((n, f_out), jnp.float32),
        in_specs=[vmem, vmem, vmem, vmem, vmem],
        out_specs=vmem,
    )(adj_t_bf16, x_bf, xt_bf, w_fused, attn_src_t)


def build_ring_adjacency_t(n):
    """Deterministic graph: bidirectional ring + self loops. adj_t[dst, src]."""
    idx = jnp.arange(n)
    a = jnp.zeros((n, n), jnp.float32)
    a = a.at[idx, (idx + 1) % n].set(1.0)
    a = a.at[(idx + 1) % n, idx].set(1.0)
    a = a + jnp.eye(n, dtype=jnp.float32)
    return a


def reference_forward(adj_t, x, w_heads, al_heads, ar_heads):
    """Pure-JAX f32 reference of the intended GAT math (exact softmax / division)."""
    num_heads = w_heads.shape[0]
    heads = []
    for h in range(num_heads):
        hfeat = x @ w_heads[h]                      # [N, F_out]
        el = x @ al_heads[h]                        # [N]
        er = x @ ar_heads[h]                        # [N]
        e = er[:, None] + el[None, :]               # e[dst, src]
        e = jnp.where(e > 0, e, 0.01 * e)
        logits = jnp.where(adj_t > 0, e, -1e30)
        m = jnp.max(logits, axis=-1, keepdims=True)
        p = jnp.exp(logits - m) * adj_t
        att = p / jnp.sum(p, axis=-1, keepdims=True)
        heads.append(att @ hfeat)
    merged = jnp.mean(jnp.stack(heads), axis=0)
    return jnp.where(merged > 0, merged, jnp.exp(merged) - 1.0)


if __name__ == "__main__":
    N = 128          # nodes -> [N, N] attention matrix is lane-dense
    IN_DIM = 32
    OUT_DIM = 128    # per-head output dim -> lane-dense output store
    NUM_HEADS = 2

    key = jax.random.PRNGKey(0)
    kx, kw, kl, kr = jax.random.split(key, 4)
    scale = 1.0 / jnp.sqrt(jnp.float32(IN_DIM))     # tame magnitudes for the numeric check
    x = jax.random.normal(kx, (N, IN_DIM), jnp.float32)
    w_heads = jax.random.normal(kw, (NUM_HEADS, IN_DIM, OUT_DIM), jnp.float32) * scale
    al_heads = jax.random.normal(kl, (NUM_HEADS, IN_DIM), jnp.float32) * scale
    ar_heads = jax.random.normal(kr, (NUM_HEADS, IN_DIM), jnp.float32) * scale
    adj_t = build_ring_adjacency_t(N)

    # One-time packing (init-time, NOT in the per-call hot path).
    w_fused, attn_src_t = pack_gat_params(w_heads, al_heads, ar_heads)
    adj_t_bf16 = adj_t.astype(jnp.bfloat16)         # 0/1 mask -> bf16 is exact

    out = multi_head_gat_forward(adj_t_bf16, x, w_fused, attn_src_t, f_out=OUT_DIM)
    jax.block_until_ready(out)

    ref = reference_forward(adj_t, x, w_heads, al_heads, ar_heads)
    assert out.shape == (N, OUT_DIM)
    max_err = float(jnp.max(jnp.abs(out - ref)))
    # Tolerance budget: bf16 MXU operands + approx (EUP) reciprocal vs. the exact-f32
    # reference; structural bugs would be off by O(1), well outside this band.
    assert jnp.allclose(out, ref, atol=5e-2, rtol=5e-2), f"max abs err = {max_err}"

    print("KERNEL_OK")
</pallas_src>

<mosaic_0001>
module attributes {stable_mosaic.version = 11 : i64} {
  func.func @_mhgat_kernel(%arg0: memref<128x128xbf16, #tpu.memory_space<vmem>>, %arg1: memref<128x32xbf16, #tpu.memory_space<vmem>>, %arg2: memref<32x128xbf16, #tpu.memory_space<vmem>>, %arg3: memref<32x384xbf16, #tpu.memory_space<vmem>>, %arg4: memref<2x32xbf16, #tpu.memory_space<vmem>>, %arg5: memref<128x128xf32, #tpu.memory_space<vmem>>) attributes {dimension_semantics = [], scalar_prefetch = 0 : i64, scratch_operands = 0 : i64, tpu.core_type = #tpu.core_type<tc>} {
    %c0 = arith.constant 0 : index
    %c0_0 = arith.constant 0 : index
    %0 = vector.load %arg0[%c0, %c0_0] : memref<128x128xbf16, #tpu.memory_space<vmem>>, vector<128x128xbf16>
    %1 = arith.extf %0 : vector<128x128xbf16> to vector<128x128xf32>
    %c0_1 = arith.constant 0 : index
    %c0_2 = arith.constant 0 : index
    %2 = vector.load %arg1[%c0_1, %c0_2] : memref<128x32xbf16, #tpu.memory_space<vmem>>, vector<128x32xbf16>
    %c0_3 = arith.constant 0 : index
    %c0_4 = arith.constant 0 : index
    %3 = vector.load %arg3[%c0_3, %c0_4] : memref<32x384xbf16, #tpu.memory_space<vmem>>, vector<32x384xbf16>
    %cst = arith.constant dense<0.000000e+00> : vector<128x384xf32>
    %4 = tpu.matmul %2, %3, %cst {dimension_numbers = #tpu.dot_dimension_numbers<[1], [0], [0], [1], [0, 0, 1, 1], [], []>} : vector<128x32xbf16>, vector<32x384xbf16>, vector<128x384xf32> -> vector<128x384xf32>
    %c0_5 = arith.constant 0 : index
    %c0_6 = arith.constant 0 : index
    %5 = vector.load %arg4[%c0_5, %c0_6] : memref<2x32xbf16, #tpu.memory_space<vmem>>, vector<2x32xbf16>
    %c0_7 = arith.constant 0 : index
    %c0_8 = arith.constant 0 : index
    %6 = vector.load %arg2[%c0_7, %c0_8] : memref<32x128xbf16, #tpu.memory_space<vmem>>, vector<32x128xbf16>
    %cst_9 = arith.constant dense<0.000000e+00> : vector<2x128xf32>
    %7 = tpu.matmul %5, %6, %cst_9 {dimension_numbers = #tpu.dot_dimension_numbers<[1], [0], [0], [1], [0, 0, 1, 1], [], []>} : vector<2x32xbf16>, vector<32x128xbf16>, vector<2x128xf32> -> vector<2x128xf32>
    %cst_10 = arith.constant 0.000000e+00 : f32
    %8 = vector.broadcast %cst_10 : f32 to vector<128x128xf32>
    %9 = vector.extract_strided_slice %4 {offsets = [0, 256], sizes = [128, 1], strides = [1, 1]} : vector<128x384xf32> to vector<128x1xf32>
    %10 = vector.extract_strided_slice %7 {offsets = [0, 0], sizes = [1, 128], strides = [1, 1]} : vector<2x128xf32> to vector<1x128xf32>
    %11 = vector.broadcast %9 : vector<128x1xf32> to vector<128x128xf32>
    %12 = vector.broadcast %10 : vector<1x128xf32> to vector<128x128xf32>
    %13 = arith.addf %11, %12 : vector<128x128xf32>
    %cst_11 = arith.constant 0.000000e+00 : f32
    %14 = vector.broadcast %cst_11 : f32 to vector<128x128xf32>
    %15 = arith.cmpf ogt, %13, %14 : vector<128x128xf32>
    %cst_12 = arith.constant 0.00999999977 : f32
    %16 = vector.broadcast %cst_12 : f32 to vector<128x128xf32>
    %17 = arith.mulf %16, %13 : vector<128x128xf32>
    %18 = arith.select %15, %13, %17 : vector<128x128xi1>, vector<128x128xf32>
    %cst_13 = arith.constant dense<0xFF800000> : vector<128xf32>
    %19 = vector.multi_reduction <maximumf>, %18, %cst_13 [1] : vector<128x128xf32> to vector<128xf32>
    %20 = vector.shape_cast %19 : vector<128xf32> to vector<128x1xf32>
    %21 = vector.broadcast %20 : vector<128x1xf32> to vector<128x128xf32>
    %22 = arith.subf %18, %21 : vector<128x128xf32>
    %23 = math.exp %22 : vector<128x128xf32>
    %24 = arith.mulf %23, %1 : vector<128x128xf32>
    %cst_14 = arith.constant dense<0.000000e+00> : vector<128xf32>
    %25 = vector.multi_reduction <add>, %24, %cst_14 [1] : vector<128x128xf32> to vector<128xf32>
    %26 = vector.shape_cast %25 : vector<128xf32> to vector<128x1xf32>
    %cst_15 = arith.constant 1.000000e-30 : f32
    %27 = vector.broadcast %cst_15 : f32 to vector<128x1xf32>
    %28 = arith.maximumf %26, %27 : vector<128x1xf32>
    %29 = tpu.reciprocal %28 {approx = true} : vector<128x1xf32> -> vector<128x1xf32>
    %cst_16 = arith.constant 5.000000e-01 : f32
    %30 = vector.broadcast %cst_16 : f32 to vector<128x1xf32>
    %31 = arith.mulf %29, %30 : vector<128x1xf32>
    %32 = vector.extract_strided_slice %4 {offsets = [0, 0], sizes = [128, 128], strides = [1, 1]} : vector<128x384xf32> to vector<128x128xf32>
    %33 = arith.truncf %32 : vector<128x128xf32> to vector<128x128xbf16>
    %34 = arith.truncf %24 : vector<128x128xf32> to vector<128x128xbf16>
    %cst_17 = arith.constant dense<0.000000e+00> : vector<128x128xf32>
    %35 = tpu.matmul %34, %33, %cst_17 {dimension_numbers = #tpu.dot_dimension_numbers<[1], [0], [0], [1], [0, 0, 1, 1], [], []>} : vector<128x128xbf16>, vector<128x128xbf16>, vector<128x128xf32> -> vector<128x128xf32>
    %36 = vector.broadcast %31 : vector<128x1xf32> to vector<128x128xf32>
    %37 = arith.mulf %35, %36 : vector<128x128xf32>
    %38 = arith.addf %8, %37 : vector<128x128xf32>
    %39 = vector.extract_strided_slice %4 {offsets = [0, 257], sizes = [128, 1], strides = [1, 1]} : vector<128x384xf32> to vector<128x1xf32>
    %40 = vector.extract_strided_slice %7 {offsets = [1, 0], sizes = [1, 128], strides = [1, 1]} : vector<2x128xf32> to vector<1x128xf32>
    %41 = vector.broadcast %39 : vector<128x1xf32> to vector<128x128xf32>
    %42 = vector.broadcast %40 : vector<1x128xf32> to vector<128x128xf32>
    %43 = arith.addf %41, %42 : vector<128x128xf32>
    %cst_18 = arith.constant 0.000000e+00 : f32
    %44 = vector.broadcast %cst_18 : f32 to vector<128x128xf32>
    %45 = arith.cmpf ogt, %43, %44 : vector<128x128xf32>
    %cst_19 = arith.constant 0.00999999977 : f32
    %46 = vector.broadcast %cst_19 : f32 to vector<128x128xf32>
    %47 = arith.mulf %46, %43 : vector<128x128xf32>
    %48 = arith.select %45, %43, %47 : vector<128x128xi1>, vector<128x128xf32>
    %cst_20 = arith.constant dense<0xFF800000> : vector<128xf32>
    %49 = vector.multi_reduction <maximumf>, %48, %cst_20 [1] : vector<128x128xf32> to vector<128xf32>
    %50 = vector.shape_cast %49 : vector<128xf32> to vector<128x1xf32>
    %51 = vector.broadcast %50 : vector<128x1xf32> to vector<128x128xf32>
    %52 = arith.subf %48, %51 : vector<128x128xf32>
    %53 = math.exp %52 : vector<128x128xf32>
    %54 = arith.mulf %53, %1 : vector<128x128xf32>
    %cst_21 = arith.constant dense<0.000000e+00> : vector<128xf32>
    %55 = vector.multi_reduction <add>, %54, %cst_21 [1] : vector<128x128xf32> to vector<128xf32>
    %56 = vector.shape_cast %55 : vector<128xf32> to vector<128x1xf32>
    %cst_22 = arith.constant 1.000000e-30 : f32
    %57 = vector.broadcast %cst_22 : f32 to vector<128x1xf32>
    %58 = arith.maximumf %56, %57 : vector<128x1xf32>
    %59 = tpu.reciprocal %58 {approx = true} : vector<128x1xf32> -> vector<128x1xf32>
    %cst_23 = arith.constant 5.000000e-01 : f32
    %60 = vector.broadcast %cst_23 : f32 to vector<128x1xf32>
    %61 = arith.mulf %59, %60 : vector<128x1xf32>
    %62 = vector.extract_strided_slice %4 {offsets = [0, 128], sizes = [128, 128], strides = [1, 1]} : vector<128x384xf32> to vector<128x128xf32>
    %63 = arith.truncf %62 : vector<128x128xf32> to vector<128x128xbf16>
    %64 = arith.truncf %54 : vector<128x128xf32> to vector<128x128xbf16>
    %cst_24 = arith.constant dense<0.000000e+00> : vector<128x128xf32>
    %65 = tpu.matmul %64, %63, %cst_24 {dimension_numbers = #tpu.dot_dimension_numbers<[1], [0], [0], [1], [0, 0, 1, 1], [], []>} : vector<128x128xbf16>, vector<128x128xbf16>, vector<128x128xf32> -> vector<128x128xf32>
    %66 = vector.broadcast %61 : vector<128x1xf32> to vector<128x128xf32>
    %67 = arith.mulf %65, %66 : vector<128x128xf32>
    %68 = arith.addf %38, %67 : vector<128x128xf32>
    %cst_25 = arith.constant 0.000000e+00 : f32
    %69 = vector.broadcast %cst_25 : f32 to vector<128x128xf32>
    %70 = arith.cmpf ogt, %68, %69 : vector<128x128xf32>
    %71 = math.exp %68 : vector<128x128xf32>
    %cst_26 = arith.constant 1.000000e+00 : f32
    %72 = vector.broadcast %cst_26 : f32 to vector<128x128xf32>
    %73 = arith.subf %71, %72 : vector<128x128xf32>
    %74 = arith.select %70, %68, %73 : vector<128x128xi1>, vector<128x128xf32>
    %c0_27 = arith.constant 0 : index
    %c0_28 = arith.constant 0 : index
    %75 = vector.load %arg5[%c0_27, %c0_28] : memref<128x128xf32, #tpu.memory_space<vmem>>, vector<128x128xf32>
    tpu.vector_store %arg5[%c0_27, %c0_28], %74 {strides = array<i32>} : memref<128x128xf32, #tpu.memory_space<vmem>>, vector<128x128xf32>,
    return
  }
}

</mosaic_0001>

<bundles_post_ra>
// kernel: multi_head_gat_forward.1
= control target key start
LH: loop header
LB: loop body
LE: loop exit
PB: predicated region body
PF: predicated region fallthrough
CT: control target
= control target key end

     0   :  { %vm150_vm0 = vcmask 261120   ;;  %v1938_v4 = vmov 0   ;;  %v1939_v6 = vmov 0.0   ;;  %s2350_s0 = inlined_call_operand.vmem [shape: bf16[128,128], index: 0, kind: input, shape index: {}]   ;;  %s2351_s1 = inlined_call_operand.vmem [shape: bf16[128,32], index: 1, kind: input, shape index: {}]   ;;  %s2352_s2 = inlined_call_operand.vmem [shape: bf16[32,128], index: 2, kind: input, shape index: {}]   ;;  %s2353_s3 = inlined_call_operand.vmem [shape: bf16[32,384], index: 3, kind: input, shape index: {}]   ;;  %s2354_s4 = inlined_call_operand.vmem [shape: bf16[2,32], index: 4, kind: input, shape index: {}]   ;;  %s2355_s5 = inlined_call_operand.hbm [shape: f32[128,128], index: 5, kind: output, shape index: {}]  }
   0x1   :  { %v1736_v0 = vld [vmem:[%s2353_s3 + $0x8] ss:$12 sps:$4 sm:$0xff]   ;;  %v1737_v1 = vld [vmem:[%s2353_s3 + $0x20] ss:$12 sps:$4 sm:$0xff]   ;;  %1711 = vset.pattern.permute.xlu0 %v1938_v4  ;;  %207 = vmatprep.mubr.bf16.mxu0 %v1938_v4 }
   0x2   :  { %1612 = vmatprep.subr.bf16.mxu1 %v1736_v0  ;;  %v1738_v2 = vld [vmem:[%s2351_s1] sm:$0xff]   ;;  %v1739_v3 = vld [vmem:[%s2351_s1 + $0x8] sm:$0xff]   ;;  %v1740_v5 = vld [vmem:[%s2351_s1 + $0x10] sm:$0xff]  }
   0x3   :  { %1613 = vmatpush3.bf16.msra.mxu1 %v1736_v0  ;;  %1616 = vmatprep.mubr.msk.bf16.mxu1 %vm150_vm0, %v1738_v2  ;;  %v1746_v7 = vld [vmem:[%s2352_s2] sm:$0xff]   ;;  %v1747_v8 = vld [vmem:[%s2352_s2 + $0x8] sm:$0xff]  }
   0x4   :  { %1614 = vmatprep.subr.bf16.mxu1 %v1737_v1 }
   0x7   :  { %1615 = vmatpush3.bf16.msra.mxu1 %v1737_v1 }
   0x8   :  { %1632 = vmatprep.subr.bf16.mxu1 %v1939_v6 }
   0xa   :  { %1617 = vmatmul.mubr.msk.bf16.vlgmr.msra.gmra.mrb[0].mxu1 %vm150_vm0, %v1739_v3 }
   0xb   :  { %1620 = vmatprep.mubr.msk.bf16.mxu1 %vm150_vm0, %v1740_v5  ;;  %1633 = vmatpush3.bf16.msra.mxu1 %v1746_v7 }
   0xc   :  { %1634 = vmatprep.subr.bf16.mxu1 %v1939_v6 }
   0xd   :  { %10 = vsyncpa [#allocation3], 0  ;;  %v1741_v9 = vld [vmem:[%s2351_s1 + $0x18] sm:$0xff]   ;;  %v1742_v10 = vld [vmem:[%s2351_s1 + $0x20] sm:$0xff]   ;;  %vm1940_vm1 = vmmov 0   ;;  %v1941_v15 = vmov 1   ;;  %v525_v40 = vlaneseq }
   0xe   :  { %v1743_v11 = vld [vmem:[%s2351_s1 + $0x28] sm:$0xff]   ;;  %v1744_v12 = vld [vmem:[%s2351_s1 + $0x30] sm:$0xff]   ;;  %v1745_v13 = vld [vmem:[%s2351_s1 + $0x38] sm:$0xff]   ;;  %1714 = vset.pattern.permute.xlu1 %v1941_v15 }
   0xf   :  { %1635 = vmatpush3.bf16.msra.mxu1 %v1747_v8  ;;  %v385_v14 = vld [vmem:[%s2354_s4] sm:$0x1]  ;;  %v1748_v16 = vld [vmem:[%s2353_s3 + $0x4] ss:$12 sps:$4 sm:$0xff]   ;;  %v1751_v18 = vld [vmem:[%s2353_s3 + $0x1c] ss:$12 sps:$4 sm:$0xff]  }
  0x10   :  { %v1750_v17 = vld [vmem:[%s2353_s3] ss:$12 sps:$4 sm:$0xff]   ;;  %175 = vmatprep.subr.bf16.mxu0 %v1748_v16  ;;  %v1753_v19 = vld [vmem:[%s2353_s3 + $0x18] ss:$12 sps:$4 sm:$0xff]   ;;  %v526_v41 = vshrl.u32 %v525_v40, 7 }
  0x11   :  { %176 = vmatpush1.bf16.msra.mxu0 %v1750_v17 }
  0x12   :  { %1621 = vmatmul.mubr.msk.bf16.gmra.mrb[4].mxu1 %vm150_vm0, %v1741_v9  ;;  %177 = vmatprep.subr.bf16.mxu0 %v1751_v18  ;;  %v527_v44 = vsub.s32 0, %v526_v41  ;;  %v980_v46 = vsub.s32 1, %v526_v41 }
  0x13   :  { %1624 = vmatprep.mubr.msk.bf16.mxu1 %vm150_vm0, %v1742_v10 }
  0x15   :  { %178 = vmatpush1.bf16.msra.mxu0 %v1753_v19 }
  0x18   :  { %1493 = vmatmul.mubr.msk.bf16.vlgmr.msra.gmra.mrb[0].mxu0 %vm150_vm0, %v1738_v2 }
  0x19   :  { %217 = vmatprep.mubr.bf16.mxu0 %v1938_v4 }
  0x1a   :  { %1625 = vmatmul.mubr.msk.bf16.gmra.mrb[8].mxu1 %vm150_vm0, %v1743_v11 }
  0x1b   :  { %1628 = vmatprep.mubr.msk.bf16.mxu1 %vm150_vm0, %v1744_v12 }
  0x20   :  { %1494 = vmatmul.mubr.msk.bf16.gmra.mrb[4].mxu0 %vm150_vm0, %v1739_v3 }
  0x21   :  { %227 = vmatprep.mubr.bf16.mxu0 %v1938_v4 }
  0x22   :  { %1629 = vmatmul.mubr.msk.bf16.gmra.mrb[12].mxu1 %vm150_vm0, %v1745_v13 }
  0x23   :  { %1636 = vmatprep.mubr.msk.bf16.mxu1 %vm1940_vm1, %v1939_v6 }
  0x28   :  { %1495 = vmatmul.mubr.msk.bf16.gmra.mrb[8].mxu0 %vm150_vm0, %v1740_v5 }
  0x29   :  { %237 = vmatprep.mubr.bf16.mxu0 %v1938_v4 }
  0x2a   :  { %1637 = vmatmul.mubr.msk.bf16.vlgmr.msra.gmra.mrb[16].mxu1 %vm150_vm0, %v385_v14 }
  0x30   :  { %1496 = vmatmul.mubr.msk.bf16.gmra.mrb[12].mxu0 %vm150_vm0, %v1741_v9 }
  0x31   :  { %247 = vmatprep.mubr.bf16.mxu0 %v1938_v4 }
  0x38   :  { %1497 = vmatmul.mubr.msk.bf16.gmra.mrb[16].mxu0 %vm150_vm0, %v1742_v10 }
  0x39   :  { %257 = vmatprep.mubr.bf16.mxu0 %v1938_v4 }
  0x40   :  { %1498 = vmatmul.mubr.msk.bf16.gmra.mrb[20].mxu0 %vm150_vm0, %v1743_v11 }
  0x41   :  { %267 = vmatprep.mubr.bf16.mxu0 %v1938_v4 }
  0x48   :  { %1499 = vmatmul.mubr.msk.bf16.gmra.mrb[24].mxu0 %vm150_vm0, %v1744_v12 }
  0x49   :  { %277 = vmatprep.mubr.bf16.mxu0 %v1938_v4 }
  0x50   :  { %1500 = vmatmul.mubr.msk.bf16.gmra.mrb[28].mxu0 %vm150_vm0, %v1745_v13 }
  0xdd   :  { %v1618_v20 = vpop.f32.mrb[0].mxu1 }
  0xde   :  { %457 = vperm.xlu0 %1711, %v1618_v20   ;;  %v322_v21 = vpop.f32.mrb[1].mxu1 }
  0xdf   :  { %915 = vperm.xlu1 %1714, %v322_v21   ;;  %v1619_v22 = vpop.f32.mrb[2].mxu1 }
  0xe0   :  { %v325_v23 = vpop.f32.mrb[3].mxu1 }
  0xe2   :  { %1712 = vset.pattern.permute.xlu0 %v1941_v15 }
  0xe3   :  { %923 = vperm.xlu0 %1712, %v1618_v20   ;;  %1715 = vset.pattern.permute.xlu1 %v1938_v4 }
  0xe4   :  { %462 = vperm.xlu1 %1715, %v1619_v22  }
  0xe5   :  { %v1622_v24 = vpop.f32.mrb[4].mxu1 }
  0xe6   :  { %v338_v25 = vpop.f32.mrb[5].mxu1 }
  0xe7   :  { %1713 = vset.pattern.permute.xlu0 %v1938_v4  ;;  %v1623_v26 = vpop.f32.mrb[6].mxu1 }
  0xe8   :  { %447 = vperm.xlu0 %1713, %v322_v21   ;;  %1716 = vset.pattern.permute.xlu1 %v1941_v15  ;;  %v341_v27 = vpop.f32.mrb[7].mxu1 }
  0xe9   :  { %927 = vperm.xlu1 %1716, %v1619_v22  }
  0xeb   :  { %v209_v42 = vpop.f32.mrb[0].mxu0 }
  0xec   :  { %452 = vperm.xlu0 %1713, %v325_v23   ;;  %v2076_v43 = vpop.f32.mrb[1].mxu0 }
  0xed   :  { %919 = vperm.xlu1 %1716, %v325_v23   ;;  %v1626_v28 = vpop.f32.mrb[8].mxu1 }
  0xee   :  { %v354_v29 = vpop.f32.mrb[9].mxu1 }
  0xef   :  { %v1627_v30 = vpop.f32.mrb[10].mxu1 }
  0xf0   :  { %477 = vperm.xlu0 %1713, %v1622_v24   ;;  %v357_v31 = vpop.f32.mrb[11].mxu1 }
  0xf1   :  { %1718 = vset.pattern.permute.xlu1 %v1938_v4 }
  0xf2   :  { %467 = vperm.xlu1 %1718, %v338_v25  }
  0xf4   :  { %1717 = vset.pattern.permute.xlu0 %v1941_v15 }
  0xf5   :  { %939 = vperm.xlu0 %1717, %v1622_v24   ;;  %v1630_v32 = vpop.f32.mrb[12].mxu1 }
  0xf6   :  { %1719 = vset.pattern.permute.xlu1 %v1941_v15  ;;  %v370_v33 = vpop.f32.mrb[13].mxu1 }
  0xf7   :  { %931 = vperm.xlu1 %1719, %v338_v25   ;;  %v1631_v34 = vpop.f32.mrb[14].mxu1 }
  0xf8   :  { %v373_v35 = vpop.f32.mrb[15].mxu1 }
  0xf9   :  { %1722 = vset.pattern.permute.xlu0 %v1938_v4 }
  0xfa   :  { %472 = vperm.xlu0 %1722, %v341_v27  }
  0xfb   :  { %1720 = vset.pattern.permute.xlu1 %v1938_v4 }
  0xfc   :  { %482 = vperm.xlu1 %1720, %v1623_v26  }
  0xfd   :  { %v439_v36 = vpop.f32.mrb[16].mxu1 }
  0xfe   :  { %497 = vperm.xlu0 %1722, %v1626_v28   ;;  %v1638_v37 = vpop.f32.mrb[17].mxu1  ;;  %v2078_v45 = vrot.slane %v439_v36, %v527_v44  ;;  %v2081_v50 = vrot.slane %v439_v36, %v980_v46 }
  0xff   :  { %v442_v38 = vpop.f32.mrb[18].mxu1 }
 0x100   :  { %1721 = vset.pattern.permute.xlu1 %v1941_v15  ;;  %v1639_v39 = vpop.f32.mrb[19].mxu1 }
 0x101   :  { %943 = vperm.xlu1 %1721, %v1623_v26  }
 0x102   :  { %1723 = vset.pattern.permute.xlu0 %v1941_v15 }
 0x103   :  { %955 = vperm.xlu0 %1723, %v1626_v28  }
 0x105   :  { %935 = vperm.xlu1 %1721, %v341_v27  }
 0x107   :  { %1728 = vset.pattern.permute.xlu0 %v1938_v4 }
 0x108   :  { %492 = vperm.xlu0 %1728, %v357_v31  }
 0x109   :  { %1724 = vset.pattern.permute.xlu1 %v1938_v4 }
 0x10a   :  { %487 = vperm.xlu1 %1724, %v354_v29  }
 0x10c   :  { %517 = vperm.xlu0 %1728, %v1630_v32  }
 0x10e   :  { %1725 = vset.pattern.permute.xlu1 %v1941_v15 }
 0x10f   :  { %947 = vperm.xlu1 %1725, %v354_v29  }
 0x110   :  { %1729 = vset.pattern.permute.xlu0 %v1941_v15 }
 0x111   :  { %971 = vperm.xlu0 %1729, %v1630_v32  }
 0x113   :  { %1726 = vset.pattern.permute.xlu1 %v1938_v4 }
 0x114   :  { %502 = vperm.xlu1 %1726, %v1627_v30  }
 0x115   :  { %1734 = vset.pattern.permute.xlu0 %v1938_v4 }
 0x116   :  { %512 = vperm.xlu0 %1734, %v373_v35  }
 0x118   :  { %1727 = vset.pattern.permute.xlu1 %v1941_v15 }
 0x119   :  { %959 = vperm.xlu1 %1727, %v1627_v30  }
 0x11a   :  { %1735 = vset.pattern.permute.xlu0 %v1941_v15 }
 0x11d   :  { %951 = vperm.xlu1 %1727, %v357_v31  }
 0x121   :  { %1730 = vset.pattern.permute.xlu1 %v1938_v4 }
 0x122   :  { %507 = vperm.xlu1 %1730, %v370_v33  }
 0x126   :  { %1731 = vset.pattern.permute.xlu1 %v1941_v15 }
 0x127   :  { %963 = vperm.xlu1 %1731, %v370_v33  }
 0x12b   :  { %1732 = vset.pattern.permute.xlu1 %v1938_v4 }
 0x12c   :  { %522 = vperm.xlu1 %1732, %v1631_v34  }
 0x130   :  { %1733 = vset.pattern.permute.xlu1 %v1941_v15  ;;  %v213_v15 = vpop.f32.mrb[2].mxu0 }
 0x131   :  { %975 = vperm.xlu1 %1733, %v1631_v34   ;;  %v769_v17 = vpack.c.bf16 %v213_v15, %v209_v42  ;;  %v215_v18 = vpop.f32.mrb[3].mxu0 }
 0x132   :  { %v219_v20 = vpop.f32.mrb[4].mxu0  ;;  %v1222_v29 = vpack.c.bf16 %v215_v18, %v2076_v43 }
 0x133   :  { %v221_v21 = vpop.f32.mrb[5].mxu0  ;;  %1640 = vmatprep.subr.bf16.mxu0 %v769_v17 }
 0x134   :  { %v223_v27 = vpop.f32.mrb[6].mxu0  ;;  %1641 = vmatpush3.bf16.msra.mxu0 %v769_v17  ;;  %1672 = vmatprep.subr.bf16.mxu1 %v1222_v29 }
 0x135   :  { %967 = vperm.xlu1 %1733, %v373_v35   ;;  %v770_v30 = vpack.c.bf16 %v223_v27, %v219_v20  ;;  %v225_v31 = vpop.f32.mrb[7].mxu0  ;;  %1673 = vmatpush3.bf16.msra.mxu1 %v1222_v29 }
 0x136   :  { %v229_v33 = vpop.f32.mrb[8].mxu0  ;;  %v1223_v44 = vpack.c.bf16 %v225_v31, %v221_v21 }
 0x137   :  { %v231_v35 = vpop.f32.mrb[9].mxu0  ;;  %1642 = vmatprep.subr.bf16.mxu0 %v770_v30 }
 0x138   :  { %v233_v37 = vpop.f32.mrb[10].mxu0  ;;  %1643 = vmatpush3.bf16.msra.mxu0 %v770_v30  ;;  %1674 = vmatprep.subr.bf16.mxu1 %v1223_v44 }
 0x139   :  { %v771_v42 = vpack.c.bf16 %v233_v37, %v229_v33  ;;  %v235_v43 = vpop.f32.mrb[11].mxu0  ;;  %1675 = vmatpush3.bf16.msra.mxu1 %v1223_v44 }
 0x13a   :  { %v239_v46 = vpop.f32.mrb[12].mxu0 }
 0x13b   :  { %1644 = vmatprep.subr.bf16.mxu0 %v771_v42 }
 0x13c   :  { %1645 = vmatpush3.bf16.msra.mxu0 %v771_v42 }
 0x15d   :  { %v458_v47 = vpop.permute.xlu0 %457 }
 0x15e   :  { %v531_v48 = vadd.f32 %v2078_v45, %v458_v47  ;;  %v916_v49 = vpop.permute.xlu1 %915 }
 0x15f   :  { %v982_v54 = vadd.f32 %v2081_v50, %v916_v49 }
 0x160   :  { %vm547_vm2 = vcmp.gt.f32.partialorder %v531_v48, 0.0  ;;  %v563_v51 = vmul.f32 0.01, %v531_v48 }
 0x161   :  { %v1014_v61 = vmul.f32 0.01, %v982_v54  ;;  %vm998_vm4 = vcmp.gt.f32.partialorder %v982_v54, 0.0 }
 0x162   :  { %v924_v52 = vpop.permute.xlu0 %923  ;;  %v2083_v53 = vsel %vm547_vm2, %v531_v48, %v563_v51  ;;  %v241_v48 = vpop.f32.mrb[13].mxu0 }
 0x163   :  { %v984_v55 = vadd.f32 %v2081_v50, %v924_v52  ;;  %v463_v56 = vpop.permute.xlu1 %462  ;;  %597 = vmax.xlane.f32.xlu0 %v2083_v53  ;;  %v2093_v2 = vsel %vm998_vm4, %v982_v54, %v1014_v61  ;;  %v243_v51 = vpop.f32.mrb[14].mxu0  ;;  %v1224_v61 = vpack.c.bf16 %v235_v43, %v231_v35 }
 0x164   :  { %v532_v58 = vadd.f32 %v2078_v45, %v463_v56  ;;  %v772_v56 = vpack.c.bf16 %v243_v51, %v239_v46 }
 0x165   :  { %vm1000_vm3 = vcmp.gt.f32.partialorder %v984_v55, 0.0  ;;  %v1016_v57 = vmul.f32 0.01, %v984_v55  ;;  %1676 = vmatprep.subr.bf16.mxu1 %v1224_v61 }
 0x166   :  { %v564_v3 = vmul.f32 0.01, %v532_v58  ;;  %vm548_vm6 = vcmp.gt.f32.partialorder %v532_v58, 0.0  ;;  %1646 = vmatprep.subr.bf16.mxu0 %v772_v56  ;;  %1677 = vmatpush3.bf16.msra.mxu1 %v1224_v61 }
 0x167   :  { %v448_v59 = vpop.permute.xlu0 %447  ;;  %v2089_v60 = vsel %vm1000_vm3, %v984_v55, %v1016_v57  ;;  %v245_v57 = vpop.f32.mrb[15].mxu0  ;;  %1647 = vmatpush3.bf16.msra.mxu0 %v772_v56 }
 0x168   :  { %v529_v62 = vadd.f32 %v2078_v45, %v448_v59  ;;  %v928_v63 = vpop.permute.xlu1 %927  ;;  %1050 = vmax.xlane.f32.xlu0 %v2089_v60  ;;  %v2101_v10 = vsel %vm548_vm6, %v532_v58, %v564_v3 }
 0x169   :  { %v985_v4 = vadd.f32 %v2081_v50, %v928_v63  ;;  %v249_v63 = vpop.f32.mrb[16].mxu0 }
 0x16a   :  { %vm545_vm5 = vcmp.gt.f32.partialorder %v529_v62, 0.0  ;;  %v561_v0 = vmul.f32 0.01, %v529_v62 }
 0x16b   :  { %v453_v1 = vpop.permute.xlu0 %452  ;;  %v1017_v14 = vmul.f32 0.01, %v985_v4  ;;  %vm1001_vm8 = vcmp.gt.f32.partialorder %v985_v4, 0.0 }
 0x16c   :  { %v530_v5 = vadd.f32 %v2078_v45, %v453_v1  ;;  %v920_v6 = vpop.permute.xlu1 %919  ;;  %1046 = vmax.xlane.f32.xlu0 %v2093_v2  ;;  %v2098_v7 = vsel %vm545_vm5, %v529_v62, %v561_v0  ;;  %v1225_v62 = vpack.c.bf16 %v245_v57, %v241_v48 }
 0x16d   :  { %593 = vmax.xlane.f32.xlu1 %v2098_v7  ;;  %v983_v11 = vadd.f32 %v2081_v50, %v920_v6  ;;  %v2112_v25 = vsel %vm1001_vm8, %v985_v4, %v1017_v14  ;;  %v251_v4 = vpop.f32.mrb[17].mxu0 }
 0x16e   :  { %vm546_vm7 = vcmp.gt.f32.partialorder %v530_v5, 0.0  ;;  %v562_v8 = vmul.f32 0.01, %v530_v5  ;;  %1678 = vmatprep.subr.bf16.mxu1 %v1225_v62 }
 0x16f   :  { %v478_v9 = vpop.permute.xlu0 %477  ;;  %v1015_v26 = vmul.f32 0.01, %v983_v11  ;;  %vm999_vm10 = vcmp.gt.f32.partialorder %v983_v11, 0.0  ;;  %1679 = vmatpush3.bf16.msra.mxu1 %v1225_v62 }
 0x170   :  { %v535_v12 = vadd.f32 %v2078_v45, %v478_v9  ;;  %v2105_v13 = vsel %vm546_vm7, %v530_v5, %v562_v8  ;;  %v253_v9 = vpop.f32.mrb[18].mxu0 }
 0x171   :  { %v468_v16 = vpop.permute.xlu1 %467  ;;  %595 = vmax.xlane.f32.xlu0 %v2105_v13  ;;  %599 = vmax.xlane.f32.xlu1 %v2101_v10  ;;  %v2118_v36 = vsel %vm999_vm10, %v983_v11, %v1015_v26  ;;  %v255_v14 = vpop.f32.mrb[19].mxu0 }
 0x172   :  { %vm551_vm9 = vcmp.gt.f32.partialorder %v535_v12, 0.0  ;;  %v567_v19 = vmul.f32 0.01, %v535_v12  ;;  %v533_v22 = vadd.f32 %v2078_v45, %v468_v16  ;;  %v259_v17 = vpop.f32.mrb[20].mxu0  ;;  %v1226_v20 = vpack.c.bf16 %v255_v14, %v251_v4 }
 0x173   :  { %v261_v21 = vpop.f32.mrb[21].mxu0 }
 0x174   :  { %v940_v23 = vpop.permute.xlu0 %939  ;;  %v2110_v24 = vsel %vm551_vm9, %v535_v12, %v567_v19  ;;  %v565_v41 = vmul.f32 0.01, %v533_v22  ;;  %vm549_vm12 = vcmp.gt.f32.partialorder %v533_v22, 0.0  ;;  %v773_v12 = vpack.c.bf16 %v253_v9, %v249_v63  ;;  %1680 = vmatprep.subr.bf16.mxu1 %v1226_v20 }
 0x175   :  { %v988_v28 = vadd.f32 %v2081_v50, %v940_v23  ;;  %605 = vmax.xlane.f32.xlu0 %v2110_v24  ;;  %1052 = vmax.xlane.f32.xlu1 %v2112_v25 }
 0x176   :  { %v932_v32 = vpop.permute.xlu1 %931  ;;  %v2126_v54 = vsel %vm549_vm12, %v533_v22, %v565_v41  ;;  %1648 = vmatprep.subr.bf16.mxu0 %v773_v12  ;;  %1681 = vmatpush3.bf16.msra.mxu1 %v1226_v20 }
 0x177   :  { %vm1004_vm11 = vcmp.gt.f32.partialorder %v988_v28, 0.0  ;;  %v1020_v34 = vmul.f32 0.01, %v988_v28  ;;  %v986_v38 = vadd.f32 %v2081_v50, %v932_v32  ;;  %1649 = vmatpush3.bf16.msra.mxu0 %v773_v12 }
 0x179   :  { %v473_v39 = vpop.permute.xlu0 %472  ;;  %1048 = vmax.xlane.f32.xlu1 %v2118_v36  ;;  %v2122_v40 = vsel %vm1004_vm11, %v988_v28, %v1020_v34  ;;  %v1018_v55 = vmul.f32 0.01, %v986_v38  ;;  %vm1002_vm14 = vcmp.gt.f32.partialorder %v986_v38, 0.0  ;;  %v263_v28 = vpop.f32.mrb[22].mxu0 }
 0x17a   :  { %1058 = vmax.xlane.f32.xlu0 %v2122_v40  ;;  %v534_v0 = vadd.f32 %v2078_v45, %v473_v39  ;;  %v774_v29 = vpack.c.bf16 %v263_v28, %v259_v17  ;;  %v265_v30 = vpop.f32.mrb[23].mxu0 }
 0x17b   :  { %v483_v47 = vpop.permute.xlu1 %482  ;;  %v2135_v6 = vsel %vm1002_vm14, %v986_v38, %v1018_v55  ;;  %v269_v32 = vpop.f32.mrb[24].mxu0  ;;  %v1227_v33 = vpack.c.bf16 %v265_v30, %v261_v21 }
 0x17c   :  { %v536_v49 = vadd.f32 %v2078_v45, %v483_v47  ;;  %v566_v19 = vmul.f32 0.01, %v534_v0  ;;  %vm550_vm2 = vcmp.gt.f32.partialorder %v534_v0, 0.0  ;;  %v271_v34 = vpop.f32.mrb[25].mxu0  ;;  %1650 = vmatprep.subr.bf16.mxu0 %v774_v29 }
 0x17d   :  { %v498_v52 = vpop.permute.xlu0 %497  ;;  %v273_v41 = vpop.f32.mrb[26].mxu0  ;;  %1651 = vmatpush3.bf16.msra.mxu0 %v774_v29  ;;  %1682 = vmatprep.subr.bf16.mxu1 %v1227_v33 }
 0x17e   :  { %v539_v58 = vadd.f32 %v2078_v45, %v498_v52  ;;  %601 = vmax.xlane.f32.xlu0 %v2126_v54  ;;  %vm552_vm13 = vcmp.gt.f32.partialorder %v536_v49, 0.0  ;;  %v568_v59 = vmul.f32 0.01, %v536_v49  ;;  %v2148_v38 = vsel %vm550_vm2, %v534_v0, %v566_v19  ;;  %v275_v44 = vpop.f32.mrb[27].mxu0  ;;  %1683 = vmatpush3.bf16.msra.mxu1 %v1227_v33 }
 0x17f   :  { %v775_v43 = vpack.c.bf16 %v273_v41, %v269_v32  ;;  %v279_v46 = vpop.f32.mrb[28].mxu0  ;;  %v1228_v52 = vpack.c.bf16 %v275_v44, %v271_v34 }
 0x180   :  { %v944_v1 = vpop.permute.xlu1 %943  ;;  %v2131_v3 = vsel %vm552_vm13, %v536_v49, %v568_v59  ;;  %v571_v8 = vmul.f32 0.01, %v539_v58  ;;  %vm555_vm15 = vcmp.gt.f32.partialorder %v539_v58, 0.0  ;;  %v281_v49 = vpop.f32.mrb[29].mxu0 }
 0x181   :  { %v989_v5 = vadd.f32 %v2081_v50, %v944_v1  ;;  %607 = vmax.xlane.f32.xlu1 %v2131_v3  ;;  %1652 = vmatprep.subr.bf16.mxu0 %v775_v43  ;;  %v283_v55 = vpop.f32.mrb[30].mxu0 }
 0x182   :  { %v956_v11 = vpop.permute.xlu0 %955  ;;  %1054 = vmax.xlane.f32.xlu0 %v2135_v6  ;;  %v2140_v23 = vsel %vm555_vm15, %v539_v58, %v571_v8  ;;  %1653 = vmatpush3.bf16.msra.mxu0 %v775_v43  ;;  %v776_v58 = vpack.c.bf16 %v283_v55, %v279_v46 }
 0x183   :  { %v992_v15 = vadd.f32 %v2081_v50, %v956_v11  ;;  %vm1005_vm0 = vcmp.gt.f32.partialorder %v989_v5, 0.0  ;;  %v1021_v16 = vmul.f32 0.01, %v989_v5  ;;  %1684 = vmatprep.subr.bf16.mxu1 %v1228_v52 }
 0x184   :  { %v936_v18 = vpop.permute.xlu1 %935  ;;  %1654 = vmatprep.subr.bf16.mxu0 %v776_v58  ;;  %1685 = vmatpush3.bf16.msra.mxu1 %v1228_v52 }
 0x185   :  { %v987_v22 = vadd.f32 %v2081_v50, %v936_v18  ;;  %v2142_v26 = vsel %vm1005_vm0, %v989_v5, %v1021_v16  ;;  %v1024_v27 = vmul.f32 0.01, %v992_v15  ;;  %vm1008_vm1 = vcmp.gt.f32.partialorder %v992_v15, 0.0  ;;  %v285_v5 = vpop.f32.mrb[31].mxu0 }
 0x186   :  { %613 = vmax.xlane.f32.xlu0 %v2140_v23  ;;  %1060 = vmax.xlane.f32.xlu1 %v2142_v26  ;;  %v1229_v9 = vpack.c.bf16 %v285_v5, %v281_v49 }
 0x187   :  { %v493_v31 = vpop.permute.xlu0 %492  ;;  %v2146_v37 = vsel %vm1008_vm1, %v992_v15, %v1024_v27  ;;  %v1019_v39 = vmul.f32 0.01, %v987_v22  ;;  %vm1003_vm3 = vcmp.gt.f32.partialorder %v987_v22, 0.0  ;;  %1655 = vmatpush3.bf16.msra.mxu0 %v776_v58 }
 0x188   :  { %1686 = vmatprep.subr.bf16.mxu1 %v1229_v9  ;;  %v538_v15 = vadd.f32 %v2078_v45, %v493_v31 }
 0x189   :  { %v488_v35 = vpop.permute.xlu1 %487  ;;  %v2153_v51 = vsel %vm1003_vm3, %v987_v22, %v1019_v39  ;;  %1687 = vmatpush3.bf16.msra.mxu1 %v1229_v9 }
 0x18a   :  { %v537_v42 = vadd.f32 %v2078_v45, %v488_v35  ;;  %1066 = vmax.xlane.f32.xlu0 %v2146_v37  ;;  %603 = vmax.xlane.f32.xlu1 %v2148_v38  ;;  %v570_v21 = vmul.f32 0.01, %v538_v15  ;;  %vm554_vm9 = vcmp.gt.f32.partialorder %v538_v15, 0.0 }
 0x18b   :  { %v518_v47 = vpop.permute.xlu0 %517 }
 0x18c   :  { %vm553_vm4 = vcmp.gt.f32.partialorder %v537_v42, 0.0  ;;  %v569_v48 = vmul.f32 0.01, %v537_v42  ;;  %v543_v59 = vadd.f32 %v2078_v45, %v518_v47  ;;  %v2177_v27 = vsel %vm554_vm9, %v538_v15, %v570_v21 }
 0x18e   :  { %v948_v56 = vpop.permute.xlu1 %947  ;;  %1056 = vmax.xlane.f32.xlu1 %v2153_v51  ;;  %v2156_v57 = vsel %vm553_vm4, %v537_v42, %v569_v48  ;;  %v575_v1 = vmul.f32 0.01, %v543_v59  ;;  %vm559_vm6 = vcmp.gt.f32.partialorder %v543_v59, 0.0 }
 0x18f   :  { %v990_v61 = vadd.f32 %v2081_v50, %v948_v56  ;;  %609 = vmax.xlane.f32.xlu0 %v2156_v57 }
 0x190   :  { %v2165_v11 = vsel %vm559_vm6, %v543_v59, %v575_v1  ;;  %v972_v30 = vpop.permute.xlu0 %971 }
 0x191   :  { %vm1006_vm5 = vcmp.gt.f32.partialorder %v990_v61, 0.0  ;;  %v1022_v62 = vmul.f32 0.01, %v990_v61  ;;  %v996_v35 = vadd.f32 %v2081_v50, %v972_v30 }
 0x193   :  { %v503_v63 = vpop.permute.xlu1 %502  ;;  %v2161_v0 = vsel %vm1006_vm5, %v990_v61, %v1022_v62  ;;  %v1028_v46 = vmul.f32 0.01, %v996_v35  ;;  %vm1012_vm13 = vcmp.gt.f32.partialorder %v996_v35, 0.0 }
 0x194   :  { %v540_v4 = vadd.f32 %v2078_v45, %v503_v63  ;;  %1062 = vmax.xlane.f32.xlu0 %v2161_v0 }
 0x195   :  { %v513_v41 = vpop.permute.xlu0 %512  ;;  %v2194_v52 = vsel %vm1012_vm13, %v996_v35, %v1028_v46 }
 0x196   :  { %vm556_vm7 = vcmp.gt.f32.partialorder %v540_v4, 0.0  ;;  %v572_v8 = vmul.f32 0.01, %v540_v4  ;;  %v542_v47 = vadd.f32 %v2078_v45, %v513_v41 }
 0x198   :  { %v960_v12 = vpop.permute.xlu1 %959  ;;  %621 = vmax.xlane.f32.xlu0 %v2165_v11  ;;  %v2168_v14 = vsel %vm556_vm7, %v540_v4, %v572_v8  ;;  %v574_v58 = vmul.f32 0.01, %v542_v47  ;;  %vm558_vm15 = vcmp.gt.f32.partialorder %v542_v47, 0.0 }
 0x199   :  { %v993_v16 = vadd.f32 %v2081_v50, %v960_v12  ;;  %615 = vmax.xlane.f32.xlu1 %v2168_v14 }
 0x19a   :  { %v2200_v61 = vsel %vm558_vm15, %v542_v47, %v574_v58  ;;  %v2228_v47 = vld [vmem:[%s2350_s0] sm:$0xff]  }
 0x19b   :  { %vm1009_vm8 = vcmp.gt.f32.partialorder %v993_v16, 0.0  ;;  %v1025_v17 = vmul.f32 0.01, %v993_v16  ;;  %v1530_v58 = vunpack.c.l.bf16 %v2228_v47 }
 0x19c   :  { %v952_v18 = vpop.permute.xlu1 %951 }
 0x19d   :  { %v991_v19 = vadd.f32 %v2081_v50, %v952_v18  ;;  %v2174_v20 = vsel %vm1009_vm8, %v993_v16, %v1025_v17  ;;  %v2216_v18 = vld [vmem:[%s2350_s0 + $0x8] sm:$0xff]  }
 0x19e   :  { %1068 = vmax.xlane.f32.xlu1 %v2174_v20 }
 0x19f   :  { %v1023_v28 = vmul.f32 0.01, %v991_v19  ;;  %vm1007_vm10 = vcmp.gt.f32.partialorder %v991_v19, 0.0 }
 0x1a1   :  { %v508_v22 = vpop.permute.xlu1 %507  ;;  %v2181_v32 = vsel %vm1007_vm10, %v991_v19, %v1023_v28 }
 0x1a2   :  { %v541_v29 = vadd.f32 %v2078_v45, %v508_v22  ;;  %611 = vmax.xlane.f32.xlu1 %v2177_v27 }
 0x1a4   :  { %vm557_vm11 = vcmp.gt.f32.partialorder %v541_v29, 0.0  ;;  %v573_v31 = vmul.f32 0.01, %v541_v29 }
 0x1a6   :  { %v964_v33 = vpop.permute.xlu1 %963  ;;  %1064 = vmax.xlane.f32.xlu1 %v2181_v32  ;;  %v2184_v34 = vsel %vm557_vm11, %v541_v29, %v573_v31 }
 0x1a7   :  { %v994_v39 = vadd.f32 %v2081_v50, %v964_v33  ;;  %617 = vmax.xlane.f32.xlu0 %v2184_v34 }
 0x1a9   :  { %vm1010_vm12 = vcmp.gt.f32.partialorder %v994_v39, 0.0  ;;  %v1026_v42 = vmul.f32 0.01, %v994_v39 }
 0x1ab   :  { %v523_v43 = vpop.permute.xlu1 %522  ;;  %v2189_v44 = vsel %vm1010_vm12, %v994_v39, %v1026_v42 }
 0x1ac   :  { %v544_v48 = vadd.f32 %v2078_v45, %v523_v43  ;;  %1070 = vmax.xlane.f32.xlu0 %v2189_v44 }
 0x1ae   :  { %vm560_vm14 = vcmp.gt.f32.partialorder %v544_v48, 0.0  ;;  %v576_v49 = vmul.f32 0.01, %v544_v48 }
 0x1b0   :  { %v976_v55 = vpop.permute.xlu1 %975  ;;  %1074 = vmax.xlane.f32.xlu0 %v2194_v52  ;;  %v2197_v56 = vsel %vm560_vm14, %v544_v48, %v576_v49 }
 0x1b1   :  { %623 = vmax.xlane.f32.xlu1 %v2197_v56  ;;  %v997_v45 = vadd.f32 %v2081_v50, %v976_v55 }
 0x1b3   :  { %v1029_v4 = vmul.f32 0.01, %v997_v45  ;;  %vm1013_vm1 = vcmp.gt.f32.partialorder %v997_v45, 0.0 }
 0x1b4   :  { %v968_v59 = vpop.permute.xlu1 %967 }
 0x1b5   :  { %v995_v62 = vadd.f32 %v2081_v50, %v968_v59  ;;  %619 = vmax.xlane.f32.xlu1 %v2200_v61  ;;  %v2208_v5 = vsel %vm1013_vm1, %v997_v45, %v1029_v4  ;;  %v1531_v4 = vunpack.c.h.bf16 %v2228_v47 }
 0x1b7   :  { %vm1011_vm0 = vcmp.gt.f32.partialorder %v995_v62, 0.0  ;;  %v1027_v63 = vmul.f32 0.01, %v995_v62 }
 0x1b9   :  { %v2205_v1 = vsel %vm1011_vm0, %v995_v62, %v1027_v63 }
 0x1ba   :  { %1072 = vmax.xlane.f32.xlu1 %v2205_v1 }
 0x1be   :  { %1076 = vmax.xlane.f32.xlu1 %v2208_v5 }
 0x1f0   :  { %v598_v8 = vpop.xlane.xlu0 %597 }
 0x1f1   :  { %v627_v9 = vsub.f32 %v2083_v53, %v598_v8  ;;  %v1534_v53 = vunpack.c.l.bf16 %v2216_v18 }
 0x1f3   :  { %v645_v12 = vmul.f32 1.442695, %v627_v9 }
 0x1f5   :  { %1754 = vpow2.f32 %v645_v12  ;;  %v1051_v50 = vpop.xlane.xlu0 %1050 }
 0x1f6   :  { %v1080_v15 = vsub.f32 %v2089_v60, %v1051_v50  ;;  %v1535_v50 = vunpack.c.h.bf16 %v2216_v18 }
 0x1f8   :  { %v1098_v16 = vmul.f32 1.442695, %v1080_v15 }
 0x1f9   :  { %v1047_v17 = vpop.xlane.xlu0 %1046 }
 0x1fa   :  { %1756 = vpow2.f32 %v1098_v16  ;;  %v1078_v19 = vsub.f32 %v2093_v2, %v1047_v17  ;;  %v594_v21 = vpop.xlane.xlu1 %593 }
 0x1fb   :  { %v625_v22 = vsub.f32 %v2098_v7, %v594_v21 }
 0x1fc   :  { %v1094_v28 = vmul.f32 1.442695, %v1078_v19 }
 0x1fd   :  { %v641_v29 = vmul.f32 1.442695, %v625_v22 }
 0x1fe   :  { %v596_v30 = vpop.xlane.xlu0 %595  ;;  %v600_v31 = vpop.xlane.xlu1 %599 }
 0x1ff   :  { %v1755_v60 = vpop.eup %1754  ;;  %1758 = vpow2.f32 %v641_v29  ;;  %v626_v33 = vsub.f32 %v2105_v13, %v596_v30  ;;  %v628_v35 = vsub.f32 %v2101_v10, %v600_v31 }
 0x200   :  { %v675_v39 = vmul.f32 %v1755_v60, %v1534_v53  ;;  %1760 = vpow2.f32 %v1094_v28 }
 0x201   :  { %v643_v41 = vmul.f32 1.442695, %v626_v33  ;;  %v647_v42 = vmul.f32 1.442695, %v628_v35 }
 0x202   :  { %v606_v2 = vpop.xlane.xlu0 %605  ;;  %v1053_v43 = vpop.xlane.xlu1 %1052  ;;  %693 = vadd.xlane.f32.xlu0 %v675_v39 }
 0x203   :  { %1762 = vpow2.f32 %v643_v41  ;;  %v631_v7 = vsub.f32 %v2110_v24, %v606_v2  ;;  %v1081_v46 = vsub.f32 %v2112_v25, %v1053_v43 }
 0x204   :  { %v1757_v13 = vpop.eup %1756  ;;  %1764 = vpow2.f32 %v647_v42 }
 0x205   :  { %v653_v10 = vmul.f32 1.442695, %v631_v7  ;;  %v1100_v48 = vmul.f32 1.442695, %v1081_v46  ;;  %v2230_v49 = vmul.f32 %v1757_v13, %v1534_v53 }
 0x206   :  { %v1049_v55 = vpop.xlane.xlu1 %1048 }
 0x207   :  { %1766 = vpow2.f32 %v653_v10  ;;  %v1079_v59 = vsub.f32 %v2118_v36, %v1049_v55  ;;  %v1059_v24 = vpop.xlane.xlu0 %1058  ;;  %1146 = vadd.xlane.f32.xlu0 %v2230_v49  ;;  %v2241_v36 = vld [vmem:[%s2350_s0 + $0x18] sm:$0xff]  }
 0x208   :  { %1768 = vpow2.f32 %v1100_v48  ;;  %v1084_v25 = vsub.f32 %v2122_v40, %v1059_v24  ;;  %v1542_v53 = vunpack.c.l.bf16 %v2241_v36 }
 0x209   :  { %v1759_v45 = vpop.eup %1758  ;;  %v1096_v62 = vmul.f32 1.442695, %v1079_v59 }
 0x20a   :  { %v1106_v63 = vmul.f32 1.442695, %v1084_v25  ;;  %v673_v8 = vmul.f32 %v1759_v45, %v1530_v58  ;;  %v1761_v9 = vpop.eup %1760 }
 0x20b   :  { %1770 = vpow2.f32 %v1096_v62  ;;  %v602_v12 = vpop.xlane.xlu0 %601  ;;  %v1126_v22 = vmul.f32 %v1761_v9, %v1530_v58 }
 0x20c   :  { %1772 = vpow2.f32 %v1106_v63  ;;  %v629_v15 = vsub.f32 %v2126_v54, %v602_v12  ;;  %689 = vadd.xlane.f32.xlu0 %v673_v8 }
 0x20d   :  { %v1763_v40 = vpop.eup %1762 }
 0x20e   :  { %v1765_v16 = vpop.eup %1764  ;;  %v649_v17 = vmul.f32 1.442695, %v629_v15  ;;  %v674_v19 = vmul.f32 %v1763_v40, %v1531_v4  ;;  %v608_v21 = vpop.xlane.xlu1 %607 }
 0x20f   :  { %v632_v28 = vsub.f32 %v2131_v3, %v608_v21  ;;  %v1055_v18 = vpop.xlane.xlu0 %1054  ;;  %v676_v29 = vmul.f32 %v1765_v16, %v1535_v50 }
 0x210   :  { %1774 = vpow2.f32 %v649_v17  ;;  %v777_v30 = vpack.c.bf16 %v674_v19, %v673_v8  ;;  %v1082_v31 = vsub.f32 %v2135_v6, %v1055_v18  ;;  %1142 = vadd.xlane.f32.xlu0 %v1126_v22  ;;  %v1543_v8 = vunpack.c.h.bf16 %v2241_v36 }
 0x211   :  { %v1767_v60 = vpop.eup %1766  ;;  %v655_v54 = vmul.f32 1.442695, %v632_v28  ;;  %695 = vadd.xlane.f32.xlu1 %v676_v29  ;;  %v778_v33 = vpack.c.bf16 %v676_v29, %v675_v39  ;;  %v2255_v39 = vld [vmem:[%s2350_s0 + $0x10] sm:$0xff]  }
 0x212   :  { %v1769_v35 = vpop.eup %1768  ;;  %v1102_v41 = vmul.f32 1.442695, %v1082_v31  ;;  %1656 = vmatprep.mubr.bf16.mxu0 %v777_v30  ;;  %v2247_v42 = vmul.f32 %v1767_v60, %v1542_v53  ;;  %v1539_v30 = vunpack.c.h.bf16 %v2255_v39  ;;  %v2281_v60 = vld [vmem:[%s2350_s0 + $0x20] sm:$0xff]  }
 0x213   :  { %1776 = vpow2.f32 %v655_v54  ;;  %v614_v2 = vpop.xlane.xlu0 %613  ;;  %v1061_v43 = vpop.xlane.xlu1 %1060  ;;  %1657 = vmatmul.mubr.bf16.vlgmr.msra.gmra.mrb[32].mxu0 %v778_v33  ;;  %v1129_v3 = vmul.f32 %v1769_v35, %v1535_v50 }
 0x214   :  { %1778 = vpow2.f32 %v1102_v41  ;;  %v635_v7 = vsub.f32 %v2140_v23, %v614_v2  ;;  %v1085_v6 = vsub.f32 %v2142_v26, %v1061_v43  ;;  %701 = vadd.xlane.f32.xlu0 %v2247_v42  ;;  %v1538_v23 = vunpack.c.l.bf16 %v2255_v39 }
 0x215   :  { %v1771_v46 = vpop.eup %1770  ;;  %1148 = vadd.xlane.f32.xlu1 %v1129_v3  ;;  %v1231_v45 = vpack.c.bf16 %v1129_v3, %v2230_v49 }
 0x216   :  { %v1773_v47 = vpop.eup %1772  ;;  %v1127_v13 = vmul.f32 %v1771_v46, %v1531_v4  ;;  %v661_v10 = vmul.f32 1.442695, %v635_v7  ;;  %v1108_v48 = vmul.f32 1.442695, %v1085_v6  ;;  %v1546_v7 = vunpack.c.l.bf16 %v2281_v60 }
 0x217   :  { %v1067_v55 = vpop.xlane.xlu0 %1066  ;;  %v604_v58 = vpop.xlane.xlu1 %603  ;;  %v2257_v59 = vmul.f32 %v1773_v47, %v1542_v53 }
 0x218   :  { %v1230_v26 = vpack.c.bf16 %v1127_v13, %v1126_v22  ;;  %1780 = vpow2.f32 %v661_v10  ;;  %v1088_v24 = vsub.f32 %v2146_v37, %v1067_v55  ;;  %v630_v25 = vsub.f32 %v2148_v38, %v604_v58  ;;  %v2269_v38 = vld [vmem:[%s2350_s0 + $0x28] sm:$0xff]  }
 0x219   :  { %1782 = vpow2.f32 %v1108_v48  ;;  %691 = vadd.xlane.f32.xlu1 %v674_v19  ;;  %1154 = vadd.xlane.f32.xlu0 %v2257_v59  ;;  %v1550_v21 = vunpack.c.l.bf16 %v2269_v38 }
 0x21a   :  { %v1775_v62 = vpop.eup %1774  ;;  %v1114_v63 = vmul.f32 1.442695, %v1088_v24  ;;  %v651_v4 = vmul.f32 1.442695, %v630_v25  ;;  %1688 = vmatprep.mubr.bf16.mxu1 %v1230_v26  ;;  %v2295_v26 = vld [vmem:[%s2350_s0 + $0x38] sm:$0xff]  }
 0x21b   :  { %v1057_v9 = vpop.xlane.xlu1 %1056  ;;  %1689 = vmatmul.mubr.bf16.vlgmr.msra.gmra.mrb[20].mxu1 %v1231_v45  ;;  %v677_v12 = vmul.f32 %v1775_v62, %v1538_v23  ;;  %v1558_v45 = vunpack.c.l.bf16 %v2295_v26 }
 0x21c   :  { %1784 = vpow2.f32 %v1114_v63  ;;  %v1083_v37 = vsub.f32 %v2153_v51, %v1057_v9  ;;  %v610_v50 = vpop.xlane.xlu0 %609 }
 0x21d   :  { %v1777_v49 = vpop.eup %1776  ;;  %1786 = vpow2.f32 %v651_v4  ;;  %v633_v15 = vsub.f32 %v2156_v57, %v610_v50  ;;  %1144 = vadd.xlane.f32.xlu1 %v1127_v13  ;;  %697 = vadd.xlane.f32.xlu0 %v677_v12 }
 0x21e   :  { %v1779_v40 = vpop.eup %1778  ;;  %v1104_v36 = vmul.f32 1.442695, %v1083_v37  ;;  %v680_v16 = vmul.f32 %v1777_v49, %v1543_v8 }
 0x21f   :  { %v657_v17 = vmul.f32 1.442695, %v633_v15  ;;  %v1130_v19 = vmul.f32 %v1779_v40, %v1538_v23 }
 0x220   :  { %1788 = vpow2.f32 %v1104_v36 }
 0x221   :  { %1790 = vpow2.f32 %v657_v17  ;;  %703 = vadd.xlane.f32.xlu1 %v680_v16  ;;  %v1063_v51 = vpop.xlane.xlu0 %1062  ;;  %1150 = vadd.xlane.f32.xlu0 %v1130_v19 }
 0x222   :  { %v1781_v22 = vpop.eup %1780  ;;  %v1086_v53 = vsub.f32 %v2161_v0, %v1063_v51 }
 0x223   :  { %v1783_v28 = vpop.eup %1782  ;;  %v2274_v18 = vmul.f32 %v1781_v22, %v1550_v21 }
 0x224   :  { %v1110_v57 = vmul.f32 1.442695, %v1086_v53  ;;  %v1133_v29 = vmul.f32 %v1783_v28, %v1543_v8 }
 0x225   :  { %v622_v31 = vpop.xlane.xlu0 %621  ;;  %709 = vadd.xlane.f32.xlu0 %v2274_v18 }
 0x226   :  { %v1785_v54 = vpop.eup %1784  ;;  %1792 = vpow2.f32 %v1110_v57  ;;  %v639_v33 = vsub.f32 %v2165_v11, %v622_v31  ;;  %1156 = vadd.xlane.f32.xlu1 %v1133_v29  ;;  %v616_v0 = vpop.xlane.xlu1 %615  ;;  %v780_v11 = vpack.c.bf16 %v680_v16, %v2247_v42  ;;  %v1233_v58 = vpack.c.bf16 %v1133_v29, %v2257_v59 }
 0x227   :  { %v1787_v35 = vpop.eup %1786  ;;  %v636_v41 = vsub.f32 %v2168_v14, %v616_v0  ;;  %v2285_v2 = vmul.f32 %v1785_v54, %v1550_v21  ;;  %v1551_v59 = vunpack.c.h.bf16 %v2269_v38  ;;  %v1547_v16 = vunpack.c.h.bf16 %v2281_v60 }
 0x228   :  { %v669_v43 = vmul.f32 1.442695, %v639_v33  ;;  %v678_v3 = vmul.f32 %v1787_v35, %v1539_v30 }
 0x229   :  { %v663_v6 = vmul.f32 1.442695, %v636_v41  ;;  %1162 = vadd.xlane.f32.xlu0 %v2285_v2 }
 0x22a   :  { %v1789_v39 = vpop.eup %1788  ;;  %1794 = vpow2.f32 %v669_v43  ;;  %v779_v46 = vpack.c.bf16 %v678_v3, %v677_v12  ;;  %699 = vadd.xlane.f32.xlu1 %v678_v3 }
 0x22b   :  { %v1791_v47 = vpop.eup %1790  ;;  %1796 = vpow2.f32 %v663_v6  ;;  %v1069_v13 = vpop.xlane.xlu1 %1068  ;;  %v1131_v10 = vmul.f32 %v1789_v39, %v1539_v30 }
 0x22c   :  { %v1089_v14 = vsub.f32 %v2174_v20, %v1069_v13  ;;  %1660 = vmatprep.mubr.bf16.mxu0 %v779_v46  ;;  %v681_v48 = vmul.f32 %v1791_v47, %v1546_v7 }
 0x22d   :  { %1661 = vmatmul.mubr.bf16.gmra.mrb[36].mxu0 %v780_v11  ;;  %v1232_v55 = vpack.c.bf16 %v1131_v10, %v1130_v19  ;;  %v1565_v19 = vld [vmem:[%s2350_s0 + $0x30] sm:$0xff]   ;;  %s1942_s0 = smov [#allocation2]  }
 0x22e   :  { %v1116_v23 = vmul.f32 1.442695, %v1089_v14  ;;  %1152 = vadd.xlane.f32.xlu1 %v1131_v10  ;;  %705 = vadd.xlane.f32.xlu0 %v681_v48  ;;  %v1555_v14 = vunpack.c.h.bf16 %v1565_v19  ;;  %s1468_s13 = sshll.u32 %s1942_s0, 4  ;;  %s1469_s13 = int_to_ptr.vmem [resolvable:$true] %s1468_s13 }
 0x22f   :  { %v612_v42 = vpop.xlane.xlu1 %611  ;;  %1692 = vmatprep.mubr.bf16.mxu1 %v1232_v55  ;;  %s1914_s14 = scalar_lea.vmem %s1469_s13, 2048  ;;  %p1919_p1 = scmp.lt.s32.totalorder %s1469_s13, %s1469_s13 }
 0x230   :  { %v1793_v24 = vpop.eup %1792  ;;  %1798 = vpow2.f32 %v1116_v23  ;;  %v634_v20 = vsub.f32 %v2177_v27, %v612_v42  ;;  %1693 = vmatmul.mubr.bf16.gmra.mrb[24].mxu1 %v1233_v58  ;;  %p1915_p0 = scmp.ne.s32.totalorder %s1469_s13, %s1914_s14  ;;  %p1920_p2 = scmp.lt.s32.totalorder %s1914_s14, %s1914_s14 }
 0x231   :  { %v1134_v25 = vmul.f32 %v1793_v24, %v1546_v7 }
 0x232   :  { %v659_v62 = vmul.f32 1.442695, %v634_v20  ;;  %p1921_p3 = por %p1920_p2, %p1919_p1 }
 0x233   :  { %v1065_v63 = vpop.xlane.xlu1 %1064  ;;  %1158 = vadd.xlane.f32.xlu0 %v1134_v25 }
 0x234   :  { %v1795_v4 = vpop.eup %1794  ;;  %1800 = vpow2.f32 %v659_v62  ;;  %v1087_v8 = vsub.f32 %v2181_v32, %v1065_v63  ;;  %v618_v9 = vpop.xlane.xlu0 %617  ;;  %p1922_p4 = pnand %p1921_p3, %p1915_p0 }
 0x235   :  { %v1797_v12 = vpop.eup %1796  ;;  %v637_v37 = vsub.f32 %v2184_v34, %v618_v9  ;;  %v2304_v27 = vmul.f32 %v1795_v4, %v1558_v45 }
 0x236   :  { %v1112_v50 = vmul.f32 1.442695, %v1087_v8  ;;  %v684_v49 = vmul.f32 %v1797_v12, %v1551_v59 }
 0x237   :  { %v665_v15 = vmul.f32 1.442695, %v637_v37  ;;  %717 = vadd.xlane.f32.xlu0 %v2304_v27 }
 0x238   :  { %1802 = vpow2.f32 %v1112_v50  ;;  %711 = vadd.xlane.f32.xlu1 %v684_v49  ;;  %v782_v60 = vpack.c.bf16 %v684_v49, %v2274_v18 }
 0x239   :  { %1804 = vpow2.f32 %v665_v15  ;;  %v1071_v38 = vpop.xlane.xlu0 %1070 }
 0x23a   :  { %v1799_v40 = vpop.eup %1798  ;;  %v1090_v32 = vsub.f32 %v2189_v44, %v1071_v38  ;;  %v1554_v44 = vunpack.c.l.bf16 %v1565_v19 }
 0x23b   :  { %v1137_v36 = vmul.f32 %v1799_v40, %v1551_v59 }
 0x23c   :  { %v1118_v34 = vmul.f32 1.442695, %v1090_v32 }
 0x23d   :  { %v1075_v17 = vpop.xlane.xlu0 %1074  ;;  %1164 = vadd.xlane.f32.xlu1 %v1137_v36  ;;  %v1235_v43 = vpack.c.bf16 %v1137_v36, %v2285_v2 }
 0x23e   :  { %v1801_v21 = vpop.eup %1800  ;;  %1806 = vpow2.f32 %v1118_v34  ;;  %v1092_v51 = vsub.f32 %v2194_v52, %v1075_v17  ;;  %v624_v22 = vpop.xlane.xlu1 %623 }
 0x23f   :  { %v640_v53 = vsub.f32 %v2197_v56, %v624_v22  ;;  %v682_v28 = vmul.f32 %v1801_v21, %v1547_v16 }
 0x240   :  { %v1122_v57 = vmul.f32 1.442695, %v1092_v51 }
 0x241   :  { %v671_v29 = vmul.f32 1.442695, %v640_v53  ;;  %v781_v30 = vpack.c.bf16 %v682_v28, %v681_v48  ;;  %707 = vadd.xlane.f32.xlu1 %v682_v28 }
 0x242   :  { %v1803_v31 = vpop.eup %1802  ;;  %1808 = vpow2.f32 %v1122_v57  ;;  %v620_v54 = vpop.xlane.xlu1 %619 }
 0x243   :  { %v1805_v33 = vpop.eup %1804  ;;  %1810 = vpow2.f32 %v671_v29  ;;  %v638_v0 = vsub.f32 %v2200_v61, %v620_v54  ;;  %1664 = vmatprep.mubr.bf16.mxu0 %v781_v30  ;;  %v1135_v52 = vmul.f32 %v1803_v31, %v1547_v16  ;;  %v1559_v61 = vunpack.c.h.bf16 %v2295_v26 }
 0x244   :  { %1665 = vmatmul.mubr.bf16.gmra.mrb[40].mxu0 %v782_v60  ;;  %v685_v35 = vmul.f32 %v1805_v33, %v1554_v44 }
 0x245   :  { %v667_v56 = vmul.f32 1.442695, %v638_v0  ;;  %v1234_v41 = vpack.c.bf16 %v1135_v52, %v1134_v25  ;;  %1160 = vadd.xlane.f32.xlu1 %v1135_v52 }
 0x246   :  { %713 = vadd.xlane.f32.xlu0 %v685_v35 }
 0x247   :  { %1812 = vpow2.f32 %v667_v56  ;;  %v1073_v3 = vpop.xlane.xlu1 %1072  ;;  %1696 = vmatprep.mubr.bf16.mxu1 %v1234_v41 }
 0x248   :  { %v1807_v18 = vpop.eup %1806  ;;  %v1091_v7 = vsub.f32 %v2205_v1, %v1073_v3  ;;  %1697 = vmatmul.mubr.bf16.gmra.mrb[28].mxu1 %v1235_v43 }
 0x249   :  { %v1138_v6 = vmul.f32 %v1807_v18, %v1554_v44 }
 0x24a   :  { %v1120_v39 = vmul.f32 1.442695, %v1091_v7 }
 0x24b   :  { %v1077_v46 = vpop.xlane.xlu1 %1076  ;;  %1166 = vadd.xlane.f32.xlu0 %v1138_v6 }
 0x24c   :  { %v1809_v47 = vpop.eup %1808  ;;  %1814 = vpow2.f32 %v1120_v39  ;;  %v1093_v11 = vsub.f32 %v2208_v5, %v1077_v46 }
 0x24d   :  { %v1811_v13 = vpop.eup %1810  ;;  %v1140_v2 = vmul.f32 %v1809_v47, %v1558_v45 }
 0x24e   :  { %v1124_v10 = vmul.f32 1.442695, %v1093_v11  ;;  %v688_v48 = vmul.f32 %v1811_v13, %v1559_v61 }
 0x24f   :  { %1170 = vadd.xlane.f32.xlu0 %v1140_v2 }
 0x250   :  { %1816 = vpow2.f32 %v1124_v10  ;;  %719 = vadd.xlane.f32.xlu1 %v688_v48  ;;  %v784_v23 = vpack.c.bf16 %v688_v48, %v2304_v27 }
 0x251   :  { %v1813_v1 = vpop.eup %1812 }
 0x252   :  { %v686_v55 = vmul.f32 %v1813_v1, %v1555_v14 }
 0x254   :  { %v783_v58 = vpack.c.bf16 %v686_v55, %v685_v35  ;;  %715 = vadd.xlane.f32.xlu1 %v686_v55 }
 0x256   :  { %v1815_v42 = vpop.eup %1814  ;;  %1668 = vmatprep.mubr.bf16.mxu0 %v783_v58 }
 0x257   :  { %v1139_v24 = vmul.f32 %v1815_v42, %v1555_v14  ;;  %1669 = vmatmul.mubr.bf16.gmra.mrb[44].mxu0 %v784_v23 }
 0x259   :  { %v1236_v5 = vpack.c.bf16 %v1139_v24, %v1138_v6  ;;  %1168 = vadd.xlane.f32.xlu1 %v1139_v24 }
 0x25a   :  { %v1817_v26 = vpop.eup %1816 }
 0x25b   :  { %v1141_v20 = vmul.f32 %v1817_v26, %v1559_v61  ;;  %1700 = vmatprep.mubr.bf16.mxu1 %v1236_v5 }
 0x25d   :  { %v1237_v25 = vpack.c.bf16 %v1141_v20, %v1140_v2  ;;  %1172 = vadd.xlane.f32.xlu1 %v1141_v20 }
 0x25f   :  { %1701 = vmatmul.mubr.bf16.gmra.mrb[32].mxu1 %v1237_v25 }
 0x28f   :  { %v694_v45 = vpop.xlane.xlu0 %693 }
 0x290   :  { %v723_v27 = vmax.f32 %v694_v45, 1e-30 }
 0x292   :  { %1818 = vrcp.f32 %v723_v27 }
 0x294   :  { %v1147_v62 = vpop.xlane.xlu0 %1146 }
 0x295   :  { %v1176_v50 = vmax.f32 %v1147_v62, 1e-30 }
 0x297   :  { %1820 = vrcp.f32 %v1176_v50 }
 0x299   :  { %v690_v63 = vpop.xlane.xlu0 %689 }
 0x29a   :  { %v721_v49 = vmax.f32 %v690_v63, 1e-30 }
 0x29c   :  { %1822 = vrcp.f32 %v721_v49  ;;  %v1819_v21 = vpop.eup %1818 }
 0x29d   :  { %v1143_v8 = vpop.xlane.xlu0 %1142  ;;  %v755_v43 = vmul.f32 0.5, %v1819_v21 }
 0x29e   :  { %v696_v59 = vpop.xlane.xlu1 %695  ;;  %v1174_v38 = vmax.f32 %v1143_v8, 1e-30 }
 0x29f   :  { %v724_v32 = vmax.f32 %v696_v59, 1e-30 }
 0x2a0   :  { %1824 = vrcp.f32 %v1174_v38 }
 0x2a1   :  { %v702_v12 = vpop.xlane.xlu0 %701  ;;  %1826 = vrcp.f32 %v724_v32  ;;  %v1821_v53 = vpop.eup %1820 }
 0x2a2   :  { %v1149_v4 = vpop.xlane.xlu1 %1148  ;;  %v727_v28 = vmax.f32 %v702_v12, 1e-30  ;;  %v1208_v3 = vmul.f32 0.5, %v1821_v53 }
 0x2a3   :  { %v1177_v36 = vmax.f32 %v1149_v4, 1e-30 }
 0x2a5   :  { %1828 = vrcp.f32 %v1177_v36 }
 0x2a6   :  { %v692_v9 = vpop.xlane.xlu1 %691  ;;  %v1155_v15 = vpop.xlane.xlu0 %1154 }
 0x2a7   :  { %v722_v16 = vmax.f32 %v692_v9, 1e-30  ;;  %v1823_v29 = vpop.eup %1822  ;;  %v1180_v30 = vmax.f32 %v1155_v15, 1e-30 }
 0x2a8   :  { %v753_v39 = vmul.f32 0.5, %v1823_v29 }
 0x2a9   :  { %1830 = vrcp.f32 %v722_v16 }
 0x2aa   :  { %v1145_v37 = vpop.xlane.xlu1 %1144  ;;  %v698_v17 = vpop.xlane.xlu0 %697 }
 0x2ab   :  { %v1175_v34 = vmax.f32 %v1145_v37, 1e-30  ;;  %v1825_v60 = vpop.eup %1824  ;;  %v725_v54 = vmax.f32 %v698_v17, 1e-30 }
 0x2ac   :  { %v1827_v0 = vpop.eup %1826  ;;  %v1206_v61 = vmul.f32 0.5, %v1825_v60 }
 0x2ad   :  { %1832 = vrcp.f32 %v1175_v34  ;;  %v756_v47 = vmul.f32 0.5, %v1827_v0 }
 0x2ae   :  { %v704_v40 = vpop.xlane.xlu1 %703  ;;  %v1151_v51 = vpop.xlane.xlu0 %1150  ;;  %1834 = vrcp.f32 %v727_v28 }
 0x2af   :  { %v728_v52 = vmax.f32 %v704_v40, 1e-30  ;;  %v1829_v35 = vpop.eup %1828  ;;  %1836 = vrcp.f32 %v1180_v30  ;;  %v1178_v7 = vmax.f32 %v1151_v51, 1e-30 }
 0x2b0   :  { %1838 = vrcp.f32 %v725_v54  ;;  %v1209_v13 = vmul.f32 0.5, %v1829_v35 }
 0x2b1   :  { %1840 = vrcp.f32 %v728_v52 }
 0x2b2   :  { %v710_v41 = vpop.xlane.xlu0 %709  ;;  %1842 = vrcp.f32 %v1178_v7 }
 0x2b3   :  { %v1157_v19 = vpop.xlane.xlu1 %1156  ;;  %v1831_v56 = vpop.eup %1830  ;;  %v731_v16 = vmax.f32 %v710_v41, 1e-30 }
 0x2b4   :  { %v1181_v46 = vmax.f32 %v1157_v19, 1e-30  ;;  %v754_v14 = vmul.f32 0.5, %v1831_v56 }
 0x2b6   :  { %1844 = vrcp.f32 %v1181_v46  ;;  %v2323_v45 = vpop.xlane.xlu0 %1162 }
 0x2b7   :  { %v700_v57 = vpop.xlane.xlu1 %699  ;;  %v1833_v18 = vpop.eup %1832  ;;  %v1184_v28 = vmax.f32 %v2323_v45, 1e-30 }
 0x2b8   :  { %v726_v2 = vmax.f32 %v700_v57, 1e-30  ;;  %v1207_v24 = vmul.f32 0.5, %v1833_v18  ;;  %v1835_v37 = vpop.eup %1834 }
 0x2b9   :  { %v1837_v50 = vpop.eup %1836 }
 0x2ba   :  { %1846 = vrcp.f32 %v726_v2  ;;  %v1839_v38 = vpop.eup %1838 }
 0x2bb   :  { %v1153_v6 = vpop.xlane.xlu1 %1152  ;;  %v1841_v40 = vpop.eup %1840  ;;  %v757_v57 = vmul.f32 0.5, %v1839_v38 }
 0x2bc   :  { %v1179_v55 = vmax.f32 %v1153_v6, 1e-30  ;;  %v706_v32 = vpop.xlane.xlu0 %705  ;;  %v1843_v36 = vpop.eup %1842  ;;  %v760_v54 = vmul.f32 0.5, %v1841_v40 }
 0x2bd   :  { %v729_v30 = vmax.f32 %v706_v32, 1e-30 }
 0x2be   :  { %1848 = vrcp.f32 %v1179_v55 }
 0x2c0   :  { %v1845_v34 = vpop.eup %1844  ;;  %v1159_v51 = vpop.xlane.xlu0 %1158 }
 0x2c1   :  { %v1182_v52 = vmax.f32 %v1159_v51, 1e-30  ;;  %v1213_v41 = vmul.f32 0.5, %v1845_v34 }
 0x2c4   :  { %v1847_v19 = vpop.eup %1846 }
 0x2c5   :  { %v2325_v49 = vpop.xlane.xlu1 %711 }
 0x2c8   :  { %v1849_v21 = vpop.eup %1848 }
 0x2ca   :  { %v2327_v17 = vpop.xlane.xlu1 %1164 }
 0x2e6   :  { %v1658_v22 = vpop.f32.mrb[32].mxu0 }
 0x2e7   :  { %v819_v44 = vpop.f32.mrb[33].mxu0  ;;  %v884_v10 = vmul.f32 %v1658_v22, %v755_v43  ;;  %v759_v22 = vmul.f32 0.5, %v1835_v37 }
 0x2e8   :  { %v1659_v31 = vpop.f32.mrb[34].mxu0  ;;  %v882_v58 = vmul.f32 %v819_v44, %v753_v39  ;;  %v1212_v44 = vmul.f32 0.5, %v1837_v50  ;;  %v758_v39 = vmul.f32 0.5, %v1847_v19 }
 0x2e9   :  { %v822_v33 = vpop.f32.mrb[35].mxu0  ;;  %v885_v5 = vmul.f32 %v1659_v31, %v756_v47 }
 0x2ea   :  { %v883_v62 = vmul.f32 %v822_v33, %v754_v14  ;;  %v1210_v33 = vmul.f32 0.5, %v1843_v36 }
 0x2ee   :  { %v1690_v11 = vpop.f32.mrb[20].mxu1 }
 0x2ef   :  { %v1337_v48 = vmul.f32 %v1690_v11, %v1208_v3  ;;  %v1272_v1 = vpop.f32.mrb[21].mxu1  ;;  %v708_v3 = vpop.xlane.xlu1 %707 }
 0x2f0   :  { %v1335_v23 = vmul.f32 %v1272_v1, %v1206_v61  ;;  %v1691_v42 = vpop.f32.mrb[22].mxu1  ;;  %v732_v61 = vmax.f32 %v2325_v49, 1e-30  ;;  %v730_v49 = vmax.f32 %v708_v3, 1e-30 }
 0x2f1   :  { %v1353_v26 = vadd.f32 %v1337_v48, %v884_v10  ;;  %v1338_v20 = vmul.f32 %v1691_v42, %v1209_v13  ;;  %v1275_v25 = vpop.f32.mrb[23].mxu1  ;;  %v1211_v42 = vmul.f32 0.5, %v1849_v21 }
 0x2f2   :  { %v1351_v59 = vadd.f32 %v1335_v23, %v882_v58  ;;  %v1336_v63 = vmul.f32 %v1275_v25, %v1207_v24 }
 0x2f3   :  { %v1387_v4 = vmul.f32 1.442695, %v1353_v26  ;;  %v1354_v8 = vadd.f32 %v1338_v20, %v885_v5  ;;  %vm1369_vm2 = vcmp.gt.f32.partialorder %v1353_v26, 0.0 }
 0x2f4   :  { %v1383_v9 = vmul.f32 1.442695, %v1351_v59  ;;  %v1352_v12 = vadd.f32 %v1336_v63, %v883_v62  ;;  %vm1367_vm3 = vcmp.gt.f32.partialorder %v1351_v59, 0.0 }
 0x2f5   :  { %1850 = vpow2.f32 %v1387_v4  ;;  %v1389_v27 = vmul.f32 1.442695, %v1354_v8  ;;  %vm1370_vm4 = vcmp.gt.f32.partialorder %v1354_v8, 0.0 }
 0x2f6   :  { %1852 = vpow2.f32 %v1383_v9  ;;  %v1385_v15 = vmul.f32 1.442695, %v1352_v12  ;;  %vm1368_vm5 = vcmp.gt.f32.partialorder %v1352_v12, 0.0  ;;  %v1161_v9 = vpop.xlane.xlu1 %1160 }
 0x2f7   :  { %1854 = vpow2.f32 %v1389_v27  ;;  %v1185_v27 = vmax.f32 %v2327_v17, 1e-30  ;;  %v1183_v38 = vmax.f32 %v1161_v9, 1e-30 }
 0x2f8   :  { %1856 = vpow2.f32 %v1385_v15 }
 0x2f9   :  { %1858 = vrcp.f32 %v731_v16 }
 0x2fa   :  { %1860 = vrcp.f32 %v1184_v28  ;;  %v2332_v32 = vpop.xlane.xlu1 %719 }
 0x2fb   :  { %1862 = vrcp.f32 %v729_v30 }
 0x2fc   :  { %1864 = vrcp.f32 %v1182_v52 }
 0x2fd   :  { %1866 = vrcp.f32 %v732_v61 }
 0x2fe   :  { %v2334_v17 = vpop.xlane.xlu1 %715 }
 0x2ff   :  { %v1851_v53 = vpop.eup %1850 }
 0x300   :  { %v1853_v29 = vpop.eup %1852  ;;  %v1514_v31 = vadd.f32 -1.0, %v1851_v53  ;;  %v1662_v60 = vpop.f32.mrb[36].mxu0 }
 0x301   :  { %v1855_v0 = vpop.eup %1854  ;;  %v1512_v35 = vadd.f32 -1.0, %v1853_v29  ;;  %v835_v56 = vpop.f32.mrb[37].mxu0  ;;  %v888_v10 = vmul.f32 %v1662_v60, %v759_v22 }
 0x302   :  { %v1857_v43 = vpop.eup %1856  ;;  %v1433_v18 = vsel %vm1369_vm2, %v1353_v26, %v1514_v31  ;;  %v1515_v7 = vadd.f32 -1.0, %v1855_v0  ;;  %v1663_v6 = vpop.f32.mrb[38].mxu0  ;;  %v886_v55 = vmul.f32 %v835_v56, %v757_v57 }
 0x303   :  { %1449 = vst [vmem:[#allocation2 + $0x10] sm:$0xff] %v1433_v18  ;;  %v1431_v46 = vsel %vm1367_vm3, %v1351_v59, %v1512_v35  ;;  %v1513_v47 = vadd.f32 -1.0, %v1857_v43  ;;  %v838_v11 = vpop.f32.mrb[39].mxu0  ;;  %v1694_v13 = vpop.f32.mrb[24].mxu1  ;;  %v889_v24 = vmul.f32 %v1663_v6, %v760_v54 }
 0x304   :  { %1447 = vst [vmem:[#allocation2] sm:$0xff] %v1431_v46  ;;  %v1434_v2 = vsel %vm1370_vm4, %v1354_v8, %v1515_v7  ;;  %v1341_v14 = vmul.f32 %v1694_v13, %v1212_v44  ;;  %v1288_v48 = vpop.f32.mrb[25].mxu1  ;;  %v887_v25 = vmul.f32 %v838_v11, %v758_v39  ;;  %v718_v59 = vpop.xlane.xlu0 %717 }
 0x305   :  { %1450 = vst [vmem:[#allocation2 + $0x18] sm:$0xff] %v1434_v2  ;;  %v1432_v1 = vsel %vm1368_vm5, %v1352_v12, %v1513_v47  ;;  %v1339_v58 = vmul.f32 %v1288_v48, %v1210_v33  ;;  %v1695_v23 = vpop.f32.mrb[26].mxu1  ;;  %v1859_v8 = vpop.eup %1858  ;;  %v735_v53 = vmax.f32 %v718_v59, 1e-30 }
 0x306   :  { %1448 = vst [vmem:[#allocation2 + $0x8] sm:$0xff] %v1432_v1  ;;  %v1357_v5 = vadd.f32 %v1341_v14, %v888_v10  ;;  %v1342_v26 = vmul.f32 %v1695_v23, %v1213_v41  ;;  %v1291_v20 = vpop.f32.mrb[27].mxu1  ;;  %v1861_v36 = vpop.eup %1860  ;;  %v763_v56 = vmul.f32 0.5, %v1859_v8  ;;  %v736_v1 = vmax.f32 %v2332_v32, 1e-30 }
 0x307   :  { %v1355_v45 = vadd.f32 %v1339_v58, %v886_v55  ;;  %v1340_v62 = vmul.f32 %v1291_v20, %v1211_v42  ;;  %v1863_v16 = vpop.eup %1862  ;;  %v1169_v3 = vpop.xlane.xlu1 %1168  ;;  %v1216_v6 = vmul.f32 0.5, %v1861_v36 }
 0x308   :  { %v1395_v63 = vmul.f32 1.442695, %v1357_v5  ;;  %v1358_v4 = vadd.f32 %v1342_v26, %v889_v24  ;;  %v714_v40 = vpop.xlane.xlu0 %713  ;;  %v1865_v34 = vpop.eup %1864  ;;  %vm1373_vm6 = vcmp.gt.f32.partialorder %v1357_v5, 0.0  ;;  %v761_v47 = vmul.f32 0.5, %v1863_v16 }
 0x309   :  { %v1391_v12 = vmul.f32 1.442695, %v1355_v45  ;;  %v1356_v37 = vadd.f32 %v1340_v62, %v887_v25  ;;  %v1867_v21 = vpop.eup %1866  ;;  %v733_v30 = vmax.f32 %v714_v40, 1e-30  ;;  %vm1371_vm7 = vcmp.gt.f32.partialorder %v1355_v45, 0.0 }
 0x30a   :  { %1868 = vpow2.f32 %v1395_v63  ;;  %v1397_v50 = vmul.f32 1.442695, %v1358_v4  ;;  %vm1374_vm8 = vcmp.gt.f32.partialorder %v1358_v4, 0.0  ;;  %v1214_v13 = vmul.f32 0.5, %v1865_v34 }
 0x30b   :  { %1870 = vpow2.f32 %v1391_v12  ;;  %v1393_v15 = vmul.f32 1.442695, %v1356_v37  ;;  %vm1372_vm9 = vcmp.gt.f32.partialorder %v1356_v37, 0.0  ;;  %v764_v10 = vmul.f32 0.5, %v1867_v21 }
 0x30c   :  { %1872 = vpow2.f32 %v1397_v50  ;;  %v1167_v19 = vpop.xlane.xlu0 %1166  ;;  %v734_v24 = vmax.f32 %v2334_v17, 1e-30  ;;  %v1187_v32 = vmax.f32 %v1169_v3, 1e-30 }
 0x30d   :  { %1874 = vpow2.f32 %v1393_v15  ;;  %v1186_v61 = vmax.f32 %v1167_v19, 1e-30 }
 0x30e   :  { %1876 = vrcp.f32 %v1185_v27 }
 0x30f   :  { %1878 = vrcp.f32 %v730_v49 }
 0x310   :  { %1880 = vrcp.f32 %v1183_v38  ;;  %v1171_v0 = vpop.xlane.xlu0 %1170 }
 0x311   :  { %1882 = vrcp.f32 %v735_v53  ;;  %v1188_v2 = vmax.f32 %v1171_v0, 1e-30 }
 0x312   :  { %1884 = vrcp.f32 %v733_v30 }
 0x313   :  { %1886 = vrcp.f32 %v1186_v61 }
 0x314   :  { %v1869_v51 = vpop.eup %1868  ;;  %1888 = vrcp.f32 %v1188_v2 }
 0x315   :  { %v1871_v22 = vpop.eup %1870  ;;  %v1518_v28 = vadd.f32 -1.0, %v1869_v51  ;;  %1890 = vrcp.f32 %v736_v1 }
 0x316   :  { %v1873_v57 = vpop.eup %1872  ;;  %v1516_v44 = vadd.f32 -1.0, %v1871_v22  ;;  %1892 = vrcp.f32 %v734_v24 }
 0x317   :  { %v1875_v29 = vpop.eup %1874  ;;  %v1437_v31 = vsel %vm1373_vm6, %v1357_v5, %v1518_v28  ;;  %v1519_v60 = vadd.f32 -1.0, %v1873_v57  ;;  %v1666_v54 = vpop.f32.mrb[40].mxu0 }
 0x318   :  { %v1877_v33 = vpop.eup %1876  ;;  %1453 = vst [vmem:[#allocation2 + $0x30] sm:$0xff] %v1437_v31  ;;  %v1435_v52 = vsel %vm1371_vm7, %v1355_v45, %v1516_v44  ;;  %v1517_v35 = vadd.f32 -1.0, %v1875_v29  ;;  %v851_v41 = vpop.f32.mrb[41].mxu0  ;;  %v892_v55 = vmul.f32 %v1666_v54, %v763_v56 }
 0x319   :  { %v1879_v43 = vpop.eup %1878  ;;  %1451 = vst [vmem:[#allocation2 + $0x20] sm:$0xff] %v1435_v52  ;;  %v1438_v18 = vsel %vm1374_vm8, %v1358_v4, %v1519_v60  ;;  %v1667_v7 = vpop.f32.mrb[42].mxu0  ;;  %v1217_v48 = vmul.f32 0.5, %v1877_v33  ;;  %v890_v5 = vmul.f32 %v851_v41, %v761_v47 }
 0x31a   :  { %v1881_v39 = vpop.eup %1880  ;;  %1454 = vst [vmem:[#allocation2 + $0x38] sm:$0xff] %v1438_v18  ;;  %v1436_v46 = vsel %vm1372_vm9, %v1356_v37, %v1517_v35  ;;  %v854_v11 = vpop.f32.mrb[43].mxu0  ;;  %v762_v58 = vmul.f32 0.5, %v1879_v43  ;;  %v893_v45 = vmul.f32 %v1667_v7, %v764_v10 }
 0x31b   :  { %1452 = vst [vmem:[#allocation2 + $0x28] sm:$0xff] %v1436_v46  ;;  %v1698_v14 = vpop.f32.mrb[28].mxu1  ;;  %v1215_v25 = vmul.f32 0.5, %v1881_v39  ;;  %v1173_v4 = vpop.xlane.xlu1 %1172 }
 0x31c   :  { %v1345_v23 = vmul.f32 %v1698_v14, %v1216_v6  ;;  %v1304_v42 = vpop.f32.mrb[29].mxu1  ;;  %v891_v8 = vmul.f32 %v854_v11, %v762_v58  ;;  %v1189_v15 = vmax.f32 %v1173_v4, 1e-30  ;;  %v1883_v40 = vpop.eup %1882 }
 0x31d   :  { %v1343_v26 = vmul.f32 %v1304_v42, %v1214_v13  ;;  %v1699_v20 = vpop.f32.mrb[30].mxu1  ;;  %v1885_v16 = vpop.eup %1884  ;;  %v767_v43 = vmul.f32 0.5, %v1883_v40 }
 0x31e   :  { %v1361_v62 = vadd.f32 %v1345_v23, %v892_v55  ;;  %v1346_v59 = vmul.f32 %v1699_v20, %v1217_v48  ;;  %v1307_v63 = vpop.f32.mrb[31].mxu1  ;;  %v1887_v34 = vpop.eup %1886  ;;  %v765_v7 = vmul.f32 0.5, %v1885_v16 }
 0x31f   :  { %v1359_v9 = vadd.f32 %v1343_v26, %v890_v5  ;;  %v1344_v12 = vmul.f32 %v1307_v63, %v1215_v25  ;;  %v1889_v19 = vpop.eup %1888  ;;  %v1218_v39 = vmul.f32 0.5, %v1887_v34 }
 0x320   :  { %v1403_v37 = vmul.f32 1.442695, %v1361_v62  ;;  %v1362_v27 = vadd.f32 %v1346_v59, %v893_v45  ;;  %v1891_v21 = vpop.eup %1890  ;;  %vm1377_vm10 = vcmp.gt.f32.partialorder %v1361_v62, 0.0  ;;  %v1220_v3 = vmul.f32 0.5, %v1889_v19 }
 0x321   :  { %v1399_v50 = vmul.f32 1.442695, %v1359_v9  ;;  %v1360_v49 = vadd.f32 %v1344_v12, %v891_v8  ;;  %v1893_v51 = vpop.eup %1892  ;;  %vm1375_vm11 = vcmp.gt.f32.partialorder %v1359_v9, 0.0  ;;  %v768_v46 = vmul.f32 0.5, %v1891_v21 }
 0x322   :  { %1894 = vpow2.f32 %v1403_v37  ;;  %v1405_v38 = vmul.f32 1.442695, %v1362_v27  ;;  %vm1378_vm12 = vcmp.gt.f32.partialorder %v1362_v27, 0.0  ;;  %v766_v10 = vmul.f32 0.5, %v1893_v51 }
 0x323   :  { %1896 = vpow2.f32 %v1399_v50  ;;  %v1401_v36 = vmul.f32 1.442695, %v1360_v49  ;;  %vm1376_vm13 = vcmp.gt.f32.partialorder %v1360_v49, 0.0 }
 0x324   :  { %1898 = vpow2.f32 %v1405_v38 }
 0x325   :  { %1900 = vpow2.f32 %v1401_v36 }
 0x326   :  { %1902 = vrcp.f32 %v1189_v15 }
 0x327   :  { %1904 = vrcp.f32 %v1187_v32 }
 0x32a   :  { %v1670_v17 = vpop.f32.mrb[44].mxu0 }
 0x32b   :  { %v867_v22 = vpop.f32.mrb[45].mxu0  ;;  %v896_v61 = vmul.f32 %v1670_v17, %v767_v43 }
 0x32c   :  { %v1895_v53 = vpop.eup %1894  ;;  %v1671_v28 = vpop.f32.mrb[46].mxu0  ;;  %v894_v2 = vmul.f32 %v867_v22, %v765_v7 }
 0x32d   :  { %v1897_v57 = vpop.eup %1896  ;;  %v1522_v44 = vadd.f32 -1.0, %v1895_v53  ;;  %v870_v29 = vpop.f32.mrb[47].mxu0  ;;  %v897_v55 = vmul.f32 %v1671_v28, %v768_v46 }
 0x32e   :  { %v1899_v30 = vpop.eup %1898  ;;  %v1520_v31 = vadd.f32 -1.0, %v1897_v57  ;;  %v895_v24 = vmul.f32 %v870_v29, %v766_v10 }
 0x32f   :  { %v1901_v60 = vpop.eup %1900  ;;  %v1441_v54 = vsel %vm1377_vm10, %v1361_v62, %v1522_v44  ;;  %v1523_v33 = vadd.f32 -1.0, %v1899_v30 }
 0x330   :  { %v1903_v0 = vpop.eup %1902  ;;  %1457 = vst [vmem:[#allocation2 + $0x50] sm:$0xff] %v1441_v54  ;;  %v1439_v52 = vsel %vm1375_vm11, %v1359_v9, %v1520_v31  ;;  %v1521_v35 = vadd.f32 -1.0, %v1901_v60 }
 0x331   :  { %v1905_v56 = vpop.eup %1904  ;;  %1455 = vst [vmem:[#allocation2 + $0x40] sm:$0xff] %v1439_v52  ;;  %v1442_v41 = vsel %vm1378_vm12, %v1362_v27, %v1523_v33  ;;  %v1221_v13 = vmul.f32 0.5, %v1903_v0 }
 0x332   :  { %1458 = vst [vmem:[#allocation2 + $0x58] sm:$0xff] %v1442_v41  ;;  %v1440_v18 = vsel %vm1376_vm13, %v1360_v49, %v1521_v35  ;;  %v1702_v6 = vpop.f32.mrb[32].mxu1  ;;  %v1219_v1 = vmul.f32 0.5, %v1905_v56 }
 0x333   :  { %1456 = vst [vmem:[#allocation2 + $0x48] sm:$0xff] %v1440_v18  ;;  %v1349_v47 = vmul.f32 %v1702_v6, %v1220_v3  ;;  %v1320_v11 = vpop.f32.mrb[33].mxu1 }
 0x334   :  { %v1347_v14 = vmul.f32 %v1320_v11, %v1218_v39  ;;  %v1703_v48 = vpop.f32.mrb[34].mxu1 }
 0x335   :  { %v1365_v58 = vadd.f32 %v1349_v47, %v896_v61  ;;  %v1350_v23 = vmul.f32 %v1703_v48, %v1221_v13  ;;  %v1323_v42 = vpop.f32.mrb[35].mxu1 }
 0x336   :  { %v1363_v5 = vadd.f32 %v1347_v14, %v894_v2  ;;  %v1348_v26 = vmul.f32 %v1323_v42, %v1219_v1 }
 0x337   :  { %v1411_v20 = vmul.f32 1.442695, %v1365_v58  ;;  %v1366_v25 = vadd.f32 %v1350_v23, %v897_v55  ;;  %vm1381_vm14 = vcmp.gt.f32.partialorder %v1365_v58, 0.0 }
 0x338   :  { %v1407_v45 = vmul.f32 1.442695, %v1363_v5  ;;  %v1364_v62 = vadd.f32 %v1348_v26, %v895_v24  ;;  %vm1379_vm15 = vcmp.gt.f32.partialorder %v1363_v5, 0.0 }
 0x339   :  { %1906 = vpow2.f32 %v1411_v20  ;;  %v1413_v59 = vmul.f32 1.442695, %v1366_v25  ;;  %vm1382_vm0 = vcmp.gt.f32.partialorder %v1366_v25, 0.0 }
 0x33a   :  { %1908 = vpow2.f32 %v1407_v45  ;;  %v1409_v63 = vmul.f32 1.442695, %v1364_v62  ;;  %vm1380_vm1 = vcmp.gt.f32.partialorder %v1364_v62, 0.0 }
 0x33b   :  { %1910 = vpow2.f32 %v1413_v59 }
 0x33c   :  { %1912 = vpow2.f32 %v1409_v63 }
 0x343   :  { %v1907_v4 = vpop.eup %1906 }
 0x344   :  { %v1909_v8 = vpop.eup %1908  ;;  %v1526_v9 = vadd.f32 -1.0, %v1907_v4 }
 0x345   :  { %v1911_v12 = vpop.eup %1910  ;;  %v1524_v37 = vadd.f32 -1.0, %v1909_v8 }
 0x346   :  { %v1913_v27 = vpop.eup %1912  ;;  %v1445_v50 = vsel %vm1381_vm14, %v1365_v58, %v1526_v9  ;;  %v1527_v49 = vadd.f32 -1.0, %v1911_v12 }
 0x347   :  { %1461 = vst [vmem:[#allocation2 + $0x70] sm:$0xff] %v1445_v50  ;;  %v1443_v15 = vsel %vm1379_vm15, %v1363_v5, %v1524_v37  ;;  %v1525_v38 = vadd.f32 -1.0, %v1913_v27 }
 0x348   :  { %1459 = vst [vmem:[#allocation2 + $0x60] sm:$0xff] %v1443_v15  ;;  %v1446_v40 = vsel %vm1382_vm0, %v1366_v25, %v1527_v49 }
 0x349   :  { %1462 = vst [vmem:[#allocation2 + $0x78] sm:$0xff] %v1446_v40  ;;  %v1444_v32 = vsel %vm1380_vm1, %v1364_v62, %v1525_v38 }
 0x34a   :  { %1460 = vst [vmem:[#allocation2 + $0x68] sm:$0xff] %v1444_v32 }
 0x34b   :  { %1925 = shalt.err (!%p1922_p4)
}
 0x34c   :  { %s1926_s17 = scalar_lea.hbm %s2355_s5, 2048 }
 0x34d   :  { %p1927_p5 = scmp.ne.s32.totalorder %s2355_s5, %s1926_s17  ;;  %p1930_p6 = scmp.lt.u32.totalorder %s1926_s17, %s2355_s5 }
 0x34f   :  { %p1932_p7 = pnand %p1930_p6, %p1927_p5 }
 0x351   :  { %1935 = shalt.err (!%p1932_p7)
}
 0x352   :  { %s1943_s1 = smov 128   ;;  %s1944_s22 = smov 8  }
 0x353   :  { %1474 = dma.vmem_to_hbm [thread:$0]  %s1469_s13, 2048, %s2355_s5, [#allocation3], %s1943_s1, %s1943_s1, %s1944_s22  }
 0x354   :  { %1936 = dma.done.wait [#allocation3], 2048  }
 0x355   :  { %1937 = vsyncadd [#allocation3], 4294965248 }
 0x356   :  { %1478 = vsyncpa [#allocation3], 1 }

</bundles_post_ra>
